<compile_context>
chip_gen: v7x
topology: tpu7x:2x2x1
jax: 0.10.0
libtpu: 0.0.40
codegen_flags: <defaults>
</compile_context>

<pallas_src>
import math

import jax
import jax.numpy as jnp
from jax.experimental import pallas as pl
from jax.experimental.pallas import tpu as pltpu


def make_decoder_kernel(S, d_model, d_ff, d_k, d_v, n_heads, ff_chunk, eps=1e-5):
    scale = 1.0 / math.sqrt(d_k)
    num_ff_chunks = d_ff // ff_chunk

    def layernorm(x, gamma, beta):
        mu = jnp.mean(x, axis=-1, keepdims=True)
        var = jnp.mean((x - mu) ** 2, axis=-1, keepdims=True)
        return (x - mu) * jax.lax.rsqrt(var + eps) * gamma + beta

    def kernel(x_ref, bias_ref, wq_ref, wk_ref, wv_ref, wo_ref,
               g1_ref, b1_ref, w1_ref, w2_ref, g2_ref, b2_ref,
               out_ref, attn_ref, acc_ref):
        h = pl.program_id(1)

        x_f32 = x_ref[0]                         # (S, d_model) f32 for residual / LN
        x_bf = x_f32.astype(jnp.bfloat16)

        # --- per-head QKV projections (bf16 operands, f32 accumulation) ---
        q = jnp.dot(x_bf, wq_ref[0], preferred_element_type=jnp.float32)   # (S, d_k)
        k = jnp.dot(x_bf, wk_ref[0], preferred_element_type=jnp.float32)   # (S, d_k)
        v = jnp.dot(x_bf, wv_ref[0], preferred_element_type=jnp.float32)   # (S, d_v)

        # --- scaled dot-product attention for this head ---
        scores = jax.lax.dot_general(
            q.astype(jnp.bfloat16), k.astype(jnp.bfloat16),
            dimension_numbers=(((1,), (1,)), ((), ())),
            preferred_element_type=jnp.float32)                            # (S, S)
        scores = scores * scale + bias_ref[0].astype(jnp.float32)          # additive mask

        m = jnp.max(scores, axis=-1, keepdims=True)
        e = jnp.exp(scores - m)
        inv = pl.reciprocal(jnp.sum(e, axis=-1, keepdims=True), approx=True)
        a = e * inv                                                        # f32 softmax
        attn_ref[0, 0] = a

        ctx = jnp.dot(a.astype(jnp.bfloat16), v.astype(jnp.bfloat16),
                      preferred_element_type=jnp.float32)                  # (S, d_v)

        # --- fold this head's output projection; accumulate across heads ---
        @pl.when(h == 0)
        def _():
            acc_ref[...] = jnp.zeros_like(acc_ref)

        acc_ref[...] += jnp.dot(ctx.astype(jnp.bfloat16), wo_ref[0],
                                preferred_element_type=jnp.float32)        # (S, d_model)

        # --- epilogue at the last head: residual + LN, chunked FFN, residual + LN ---
        @pl.when(h == n_heads - 1)
        def _():
            y = layernorm(acc_ref[...] + x_f32, g1_ref[...], b1_ref[...])
            y_bf = y.astype(jnp.bfloat16)
            ff = jnp.zeros((S, d_model), jnp.float32)
            for c in range(num_ff_chunks):   # static unroll; never materialize (S, d_ff)
                lo, hi = c * ff_chunk, (c + 1) * ff_chunk
                h1 = jnp.maximum(
                    jnp.dot(y_bf, w1_ref[:, lo:hi],
                            preferred_element_type=jnp.float32), 0.0)
                ff = ff + jnp.dot(h1.astype(jnp.bfloat16), w2_ref[lo:hi, :],
                                  preferred_element_type=jnp.float32)
            out_ref[0] = layernorm(ff + y, g2_ref[...], b2_ref[...])

    return kernel


def decoder_layer(dec_in, mask, params, *, d_k, d_v, n_heads):
    B, S, d_model = dec_in.shape
    d_ff = params["w1"].shape[1]

    # FFN chunk width: bound the (S, ff_chunk) hidden slab instead of (S, d_ff).
    ff_chunk = d_ff
    for cand in (1024, 512, 256):
        if d_ff > cand and d_ff % cand == 0:
            ff_chunk = cand
            break

    kernel = make_decoder_kernel(S, d_model, d_ff, d_k, d_v, n_heads, ff_chunk)

    # Split heads once in the wrapper so the per-head slicing is a DMA (BlockSpec
    # index_map over the head grid axis), not an in-kernel lane slice. Cast all
    # matmul weights to bf16 (halves DMA + VMEM, feeds MXU at bf16 rate).
    bf16 = jnp.bfloat16
    wq_h = params["wq"].reshape(d_model, n_heads, d_k).transpose(1, 0, 2).astype(bf16)
    wk_h = params["wk"].reshape(d_model, n_heads, d_k).transpose(1, 0, 2).astype(bf16)
    wv_h = params["wv"].reshape(d_model, n_heads, d_v).transpose(1, 0, 2).astype(bf16)
    wo_h = params["wo"].reshape(n_heads, d_v, d_model).astype(bf16)
    w1 = params["w1"].astype(bf16)
    w2 = params["w2"].astype(bf16)

    # Additive mask bias in bf16 (matches torch masked_fill_(-1e9) semantics).
    bias = jnp.where(mask != 0, jnp.float32(-1e9), jnp.float32(0.0)).astype(bf16)

    def bcast(shape):
        return pl.BlockSpec(shape, lambda b, h, _n=len(shape): (0,) * _n)

    in_specs = [
        pl.BlockSpec((1, S, d_model), lambda b, h: (b, 0, 0)),     # dec_in (f32)
        pl.BlockSpec((1, S, S), lambda b, h: (b, 0, 0)),           # mask bias (bf16)
        pl.BlockSpec((1, d_model, d_k), lambda b, h: (h, 0, 0)),   # W_Q head slice
        pl.BlockSpec((1, d_model, d_k), lambda b, h: (h, 0, 0)),   # W_K head slice
        pl.BlockSpec((1, d_model, d_v), lambda b, h: (h, 0, 0)),   # W_V head slice
        pl.BlockSpec((1, d_v, d_model), lambda b, h: (h, 0, 0)),   # fc head slice
        bcast((1, d_model)),                                       # ln1 gamma
        bcast((1, d_model)),                                       # ln1 beta
        bcast((d_model, d_ff)),                                    # ffn W1
        bcast((d_ff, d_model)),                                    # ffn W2
        bcast((1, d_model)),                                       # ln2 gamma
        bcast((1, d_model)),                                       # ln2 beta
    ]
    out_specs = [
        pl.BlockSpec((1, S, d_model), lambda b, h: (b, 0, 0)),     # out (written at last head)
        pl.BlockSpec((1, 1, S, S), lambda b, h: (b, h, 0, 0)),     # attn (per-head slab)
    ]
    out_shape = [
        jax.ShapeDtypeStruct((B, S, d_model), jnp.float32),
        jax.ShapeDtypeStruct((B, n_heads, S, S), jnp.float32),
    ]
    return pl.pallas_call(
        kernel,
        grid=(B, n_heads),
        in_specs=in_specs,
        out_specs=out_specs,
        out_shape=out_shape,
        scratch_shapes=[pltpu.VMEM((S, d_model), jnp.float32)],    # attn-out accumulator
        compiler_params=pltpu.CompilerParams(
            dimension_semantics=("parallel", "arbitrary"),
            vmem_limit_bytes=64 * 1024 * 1024,
        ),
    )(dec_in, bias, wq_h, wk_h, wv_h, wo_h,
      params["g1"], params["b1"], w1, w2, params["g2"], params["b2"])


def reference_decoder_layer(dec_in, mask, params, *, d_k, d_v, n_heads, eps=1e-5):
    """Pure-JAX f32 reference mirroring the PyTorch module semantics."""
    B, S, d_model = dec_in.shape

    def ln(x, g, b):
        mu = jnp.mean(x, axis=-1, keepdims=True)
        var = jnp.mean((x - mu) ** 2, axis=-1, keepdims=True)
        return (x - mu) / jnp.sqrt(var + eps) * g + b

    q = (dec_in @ params["wq"]).reshape(B, S, n_heads, d_k).transpose(0, 2, 1, 3)
    k = (dec_in @ params["wk"]).reshape(B, S, n_heads, d_k).transpose(0, 2, 1, 3)
    v = (dec_in @ params["wv"]).reshape(B, S, n_heads, d_v).transpose(0, 2, 1, 3)
    scores = jnp.einsum("bhqd,bhkd->bhqk", q, k) / math.sqrt(d_k)
    scores = jnp.where(mask[:, None, :, :] != 0, -1e9, scores)
    attn = jax.nn.softmax(scores, axis=-1)
    ctx = jnp.einsum("bhqk,bhkd->bhqd", attn, v).transpose(0, 2, 1, 3).reshape(B, S, n_heads * d_v)
    y = ln(ctx @ params["wo"] + dec_in, params["g1"][0], params["b1"][0])
    h = jnp.maximum(y @ params["w1"], 0.0) @ params["w2"]
    out = ln(h + y, params["g2"][0], params["b2"][0])
    return out, attn


if __name__ == "__main__":
    # Small deterministic config
    B, S = 2, 8
    d_model, d_ff = 32, 64
    d_k = d_v = 16
    n_heads = 4

    key = jax.random.PRNGKey(0)
    ks = jax.random.split(key, 8)
    init = lambda k, shape, fan_in: (jax.random.normal(k, shape, jnp.float32) / math.sqrt(fan_in))
    params = {
        "wq": init(ks[0], (d_model, n_heads * d_k), d_model),
        "wk": init(ks[1], (d_model, n_heads * d_k), d_model),
        "wv": init(ks[2], (d_model, n_heads * d_v), d_model),
        "wo": init(ks[3], (n_heads * d_v, d_model), n_heads * d_v),
        "w1": init(ks[4], (d_model, d_ff), d_model),
        "w2": init(ks[5], (d_ff, d_model), d_ff),
        "g1": jnp.ones((1, d_model), jnp.float32),
        "b1": jnp.zeros((1, d_model), jnp.float32),
        "g2": jnp.ones((1, d_model), jnp.float32),
        "b2": jnp.zeros((1, d_model), jnp.float32),
    }

    dec_in = jax.random.normal(ks[6], (B, S, d_model), jnp.float32)
    # Causal (subsequent) mask: 1 above the diagonal => masked
    causal = (jnp.arange(S)[None, :] > jnp.arange(S)[:, None]).astype(jnp.int32)
    mask = jnp.broadcast_to(causal, (B, S, S))

    out, attn = decoder_layer(dec_in, mask, params, d_k=d_k, d_v=d_v, n_heads=n_heads)
    out, attn = jax.block_until_ready(out), jax.block_until_ready(attn)

    out_ref, attn_ref = reference_decoder_layer(dec_in, mask, params,
                                                d_k=d_k, d_v=d_v, n_heads=n_heads)
    # bf16 matmul operands (f32 accumulation) loosen agreement vs. the f32 reference.
    assert jnp.allclose(out, out_ref, atol=5e-2, rtol=5e-2), "out mismatch"
    assert jnp.allclose(attn, attn_ref, atol=5e-2, rtol=5e-2), "attn mismatch"
    print("KERNEL_OK")
</pallas_src>

<mosaic_0001>
module attributes {stable_mosaic.version = 11 : i64} {
  func.func @kernel(%arg0: i32, %arg1: i32, %arg2: memref<1x8x32xf32, #tpu.memory_space<vmem>>, %arg3: memref<1x8x8xbf16, #tpu.memory_space<vmem>>, %arg4: memref<1x32x16xbf16, #tpu.memory_space<vmem>>, %arg5: memref<1x32x16xbf16, #tpu.memory_space<vmem>>, %arg6: memref<1x32x16xbf16, #tpu.memory_space<vmem>>, %arg7: memref<1x16x32xbf16, #tpu.memory_space<vmem>>, %arg8: memref<1x32xf32, #tpu.memory_space<vmem>>, %arg9: memref<1x32xf32, #tpu.memory_space<vmem>>, %arg10: memref<32x64xbf16, #tpu.memory_space<vmem>>, %arg11: memref<64x32xbf16, #tpu.memory_space<vmem>>, %arg12: memref<1x32xf32, #tpu.memory_space<vmem>>, %arg13: memref<1x32xf32, #tpu.memory_space<vmem>>, %arg14: memref<1x8x32xf32, #tpu.memory_space<vmem>>, %arg15: memref<1x1x8x8xf32, #tpu.memory_space<vmem>>, %arg16: memref<8x32xf32, #tpu.memory_space<vmem>>) attributes {dimension_semantics = [#tpu.dimension_semantics<parallel>, #tpu.dimension_semantics<arbitrary>], iteration_bounds = array<i64: 2, 4>, scalar_prefetch = 0 : i64, scratch_operands = 1 : i64, tpu.core_type = #tpu.core_type<tc>, window_params = [{transform_indices = @transform_0, window_bounds = array<i64: 1, 8, 32>}, {transform_indices = @transform_1, window_bounds = array<i64: 1, 8, 8>}, {transform_indices = @transform_2, window_bounds = array<i64: 1, 32, 16>}, {transform_indices = @transform_3, window_bounds = array<i64: 1, 32, 16>}, {transform_indices = @transform_4, window_bounds = array<i64: 1, 32, 16>}, {transform_indices = @transform_5, window_bounds = array<i64: 1, 16, 32>}, {pipeline_mode = #tpu.pipeline_mode<synchronous>, transform_indices = @transform_6, window_bounds = array<i64: 1, 32>}, {pipeline_mode = #tpu.pipeline_mode<synchronous>, transform_indices = @transform_7, window_bounds = array<i64: 1, 32>}, {pipeline_mode = #tpu.pipeline_mode<synchronous>, transform_indices = @transform_8, window_bounds = array<i64: 32, 64>}, {pipeline_mode = #tpu.pipeline_mode<synchronous>, transform_indices = @transform_9, window_bounds = array<i64: 64, 32>}, {pipeline_mode = #tpu.pipeline_mode<synchronous>, transform_indices = @transform_10, window_bounds = array<i64: 1, 32>}, {pipeline_mode = #tpu.pipeline_mode<synchronous>, transform_indices = @transform_11, window_bounds = array<i64: 1, 32>}, {transform_indices = @transform_12, window_bounds = array<i64: 1, 8, 32>}, {transform_indices = @transform_13, window_bounds = array<i64: 1, 1, 8, 8>}]} {
    %c0 = arith.constant 0 : index
    %c0_0 = arith.constant 0 : index
    %c0_1 = arith.constant 0 : index
    %0 = vector.load %arg2[%c0, %c0_0, %c0_1] : memref<1x8x32xf32, #tpu.memory_space<vmem>>, vector<1x8x32xf32>
    %1 = vector.shape_cast %0 : vector<1x8x32xf32> to vector<8x32xf32>
    %2 = arith.truncf %1 : vector<8x32xf32> to vector<8x32xbf16>
    %c0_2 = arith.constant 0 : index
    %c0_3 = arith.constant 0 : index
    %c0_4 = arith.constant 0 : index
    %3 = vector.load %arg4[%c0_2, %c0_3, %c0_4] : memref<1x32x16xbf16, #tpu.memory_space<vmem>>, vector<1x32x16xbf16>
    %4 = vector.shape_cast %3 : vector<1x32x16xbf16> to vector<32x16xbf16>
    %cst = arith.constant dense<0.000000e+00> : vector<8x16xf32>
    %5 = tpu.matmul %2, %4, %cst {dimension_numbers = #tpu.dot_dimension_numbers<[1], [0], [0], [1], [0, 0, 1, 1], [], []>} : vector<8x32xbf16>, vector<32x16xbf16>, vector<8x16xf32> -> vector<8x16xf32>
    %c0_5 = arith.constant 0 : index
    %c0_6 = arith.constant 0 : index
    %c0_7 = arith.constant 0 : index
    %6 = vector.load %arg5[%c0_5, %c0_6, %c0_7] : memref<1x32x16xbf16, #tpu.memory_space<vmem>>, vector<1x32x16xbf16>
    %7 = vector.shape_cast %6 : vector<1x32x16xbf16> to vector<32x16xbf16>
    %cst_8 = arith.constant dense<0.000000e+00> : vector<8x16xf32>
    %8 = tpu.matmul %2, %7, %cst_8 {dimension_numbers = #tpu.dot_dimension_numbers<[1], [0], [0], [1], [0, 0, 1, 1], [], []>} : vector<8x32xbf16>, vector<32x16xbf16>, vector<8x16xf32> -> vector<8x16xf32>
    %c0_9 = arith.constant 0 : index
    %c0_10 = arith.constant 0 : index
    %c0_11 = arith.constant 0 : index
    %9 = vector.load %arg6[%c0_9, %c0_10, %c0_11] : memref<1x32x16xbf16, #tpu.memory_space<vmem>>, vector<1x32x16xbf16>
    %10 = vector.shape_cast %9 : vector<1x32x16xbf16> to vector<32x16xbf16>
    %cst_12 = arith.constant dense<0.000000e+00> : vector<8x16xf32>
    %11 = tpu.matmul %2, %10, %cst_12 {dimension_numbers = #tpu.dot_dimension_numbers<[1], [0], [0], [1], [0, 0, 1, 1], [], []>} : vector<8x32xbf16>, vector<32x16xbf16>, vector<8x16xf32> -> vector<8x16xf32>
    %12 = arith.truncf %5 : vector<8x16xf32> to vector<8x16xbf16>
    %13 = arith.truncf %8 : vector<8x16xf32> to vector<8x16xbf16>
    %cst_13 = arith.constant dense<0.000000e+00> : vector<8x8xf32>
    %14 = tpu.matmul %12, %13, %cst_13 {dimension_numbers = #tpu.dot_dimension_numbers<[1], [1], [0], [0], [0, 0, 1, 0], [], []>} : vector<8x16xbf16>, vector<8x16xbf16>, vector<8x8xf32> -> vector<8x8xf32>
    %cst_14 = arith.constant 2.500000e-01 : f32
    %15 = vector.broadcast %cst_14 : f32 to vector<8x8xf32>
    %16 = arith.mulf %14, %15 : vector<8x8xf32>
    %c0_15 = arith.constant 0 : index
    %c0_16 = arith.constant 0 : index
    %c0_17 = arith.constant 0 : index
    %17 = vector.load %arg3[%c0_15, %c0_16, %c0_17] : memref<1x8x8xbf16, #tpu.memory_space<vmem>>, vector<1x8x8xbf16>
    %18 = vector.shape_cast %17 : vector<1x8x8xbf16> to vector<8x8xbf16>
    %19 = arith.extf %18 : vector<8x8xbf16> to vector<8x8xf32>
    %20 = arith.addf %16, %19 : vector<8x8xf32>
    %cst_18 = arith.constant dense<0xFF800000> : vector<8xf32>
    %21 = vector.multi_reduction <maximumf>, %20, %cst_18 [1] : vector<8x8xf32> to vector<8xf32>
    %22 = vector.shape_cast %21 : vector<8xf32> to vector<8x1xf32>
    %23 = vector.broadcast %22 : vector<8x1xf32> to vector<8x8xf32>
    %24 = arith.subf %20, %23 : vector<8x8xf32>
    %25 = math.exp %24 : vector<8x8xf32>
    %cst_19 = arith.constant dense<0.000000e+00> : vector<8xf32>
    %26 = vector.multi_reduction <add>, %25, %cst_19 [1] : vector<8x8xf32> to vector<8xf32>
    %27 = vector.shape_cast %26 : vector<8xf32> to vector<8x1xf32>
    %28 = tpu.reciprocal %27 {approx = true} : vector<8x1xf32> -> vector<8x1xf32>
    %29 = vector.broadcast %28 : vector<8x1xf32> to vector<8x8xf32>
    %30 = arith.mulf %25, %29 : vector<8x8xf32>
    %c0_20 = arith.constant 0 : index
    %c0_21 = arith.constant 0 : index
    %c0_22 = arith.constant 0 : index
    %c0_23 = arith.constant 0 : index
    %31 = vector.load %arg15[%c0_20, %c0_21, %c0_22, %c0_23] : memref<1x1x8x8xf32, #tpu.memory_space<vmem>>, vector<1x1x8x8xf32>
    %32 = vector.shape_cast %31 : vector<1x1x8x8xf32> to vector<8x8xf32>
    %33 = vector.shape_cast %30 : vector<8x8xf32> to vector<1x1x8x8xf32>
    tpu.vector_store %arg15[%c0_20, %c0_21, %c0_22, %c0_23], %33 {strides = array<i32>} : memref<1x1x8x8xf32, #tpu.memory_space<vmem>>, vector<1x1x8x8xf32>,
    %34 = arith.truncf %30 : vector<8x8xf32> to vector<8x8xbf16>
    %35 = arith.truncf %11 : vector<8x16xf32> to vector<8x16xbf16>
    %cst_24 = arith.constant dense<0.000000e+00> : vector<8x16xf32>
    %36 = tpu.matmul %34, %35, %cst_24 {dimension_numbers = #tpu.dot_dimension_numbers<[1], [0], [0], [1], [0, 0, 1, 1], [], []>} : vector<8x8xbf16>, vector<8x16xbf16>, vector<8x16xf32> -> vector<8x16xf32>
    %c0_i32 = arith.constant 0 : i32
    %37 = arith.cmpi eq, %arg1, %c0_i32 : i32
    %38 = arith.extui %37 : i1 to i32
    %c0_i32_25 = arith.constant 0 : i32
    %39 = arith.cmpi ne, %38, %c0_i32_25 : i32
    scf.if %39 {
      %cst_35 = arith.constant 0.000000e+00 : f32
      %50 = vector.broadcast %cst_35 : f32 to vector<8x32xf32>
      %c0_36 = arith.constant 0 : index
      %c0_37 = arith.constant 0 : index
      %51 = vector.load %arg16[%c0_36, %c0_37] : memref<8x32xf32, #tpu.memory_space<vmem>>, vector<8x32xf32>
      tpu.vector_store %arg16[%c0_36, %c0_37], %50 {strides = array<i32>} : memref<8x32xf32, #tpu.memory_space<vmem>>, vector<8x32xf32>,
    } else {
    }
    %c0_26 = arith.constant 0 : index
    %c0_27 = arith.constant 0 : index
    %40 = vector.load %arg16[%c0_26, %c0_27] : memref<8x32xf32, #tpu.memory_space<vmem>>, vector<8x32xf32>
    %41 = arith.truncf %36 : vector<8x16xf32> to vector<8x16xbf16>
    %c0_28 = arith.constant 0 : index
    %c0_29 = arith.constant 0 : index
    %c0_30 = arith.constant 0 : index
    %42 = vector.load %arg7[%c0_28, %c0_29, %c0_30] : memref<1x16x32xbf16, #tpu.memory_space<vmem>>, vector<1x16x32xbf16>
    %43 = vector.shape_cast %42 : vector<1x16x32xbf16> to vector<16x32xbf16>
    %cst_31 = arith.constant dense<0.000000e+00> : vector<8x32xf32>
    %44 = tpu.matmul %41, %43, %cst_31 {dimension_numbers = #tpu.dot_dimension_numbers<[1], [0], [0], [1], [0, 0, 1, 1], [], []>} : vector<8x16xbf16>, vector<16x32xbf16>, vector<8x32xf32> -> vector<8x32xf32>
    %45 = arith.addf %40, %44 : vector<8x32xf32>
    %c0_32 = arith.constant 0 : index
    %c0_33 = arith.constant 0 : index
    %46 = vector.load %arg16[%c0_32, %c0_33] : memref<8x32xf32, #tpu.memory_space<vmem>>, vector<8x32xf32>
    tpu.vector_store %arg16[%c0_32, %c0_33], %45 {strides = array<i32>} : memref<8x32xf32, #tpu.memory_space<vmem>>, vector<8x32xf32>,
    %c3_i32 = arith.constant 3 : i32
    %47 = arith.cmpi eq, %arg1, %c3_i32 : i32
    %48 = arith.extui %47 : i1 to i32
    %c0_i32_34 = arith.constant 0 : i32
    %49 = arith.cmpi ne, %48, %c0_i32_34 : i32
    scf.if %49 {
      %c0_35 = arith.constant 0 : index
      %c0_36 = arith.constant 0 : index
      %50 = vector.load %arg16[%c0_35, %c0_36] : memref<8x32xf32, #tpu.memory_space<vmem>>, vector<8x32xf32>
      %51 = arith.addf %50, %1 : vector<8x32xf32>
      %c0_37 = arith.constant 0 : index
      %c0_38 = arith.constant 0 : index
      %52 = vector.load %arg8[%c0_37, %c0_38] : memref<1x32xf32, #tpu.memory_space<vmem>>, vector<1x32xf32>
      %c0_39 = arith.constant 0 : index
      %c0_40 = arith.constant 0 : index
      %53 = vector.load %arg9[%c0_39, %c0_40] : memref<1x32xf32, #tpu.memory_space<vmem>>, vector<1x32xf32>
      %cst_41 = arith.constant dense<0.000000e+00> : vector<8xf32>
      %54 = vector.multi_reduction <add>, %51, %cst_41 [1] : vector<8x32xf32> to vector<8xf32>
      %55 = vector.shape_cast %54 : vector<8xf32> to vector<8x1xf32>
      %cst_42 = arith.constant 3.200000e+01 : f32
      %56 = vector.broadcast %cst_42 : f32 to vector<8x1xf32>
      %57 = arith.divf %55, %56 : vector<8x1xf32>
      %58 = vector.broadcast %57 : vector<8x1xf32> to vector<8x32xf32>
      %59 = arith.subf %51, %58 : vector<8x32xf32>
      %60 = arith.mulf %59, %59 : vector<8x32xf32>
      %cst_43 = arith.constant dense<0.000000e+00> : vector<8xf32>
      %61 = vector.multi_reduction <add>, %60, %cst_43 [1] : vector<8x32xf32> to vector<8xf32>
      %62 = vector.shape_cast %61 : vector<8xf32> to vector<8x1xf32>
      %cst_44 = arith.constant 3.200000e+01 : f32
      %63 = vector.broadcast %cst_44 : f32 to vector<8x1xf32>
      %64 = arith.divf %62, %63 : vector<8x1xf32>
      %65 = vector.broadcast %57 : vector<8x1xf32> to vector<8x32xf32>
      %66 = arith.subf %51, %65 : vector<8x32xf32>
      %cst_45 = arith.constant 9.99999974E-6 : f32
      %67 = vector.broadcast %cst_45 : f32 to vector<8x1xf32>
      %68 = arith.addf %64, %67 : vector<8x1xf32>
      %69 = math.rsqrt %68 : vector<8x1xf32>
      %70 = vector.broadcast %69 : vector<8x1xf32> to vector<8x32xf32>
      %71 = arith.mulf %66, %70 : vector<8x32xf32>
      %72 = vector.broadcast %52 : vector<1x32xf32> to vector<8x32xf32>
      %73 = arith.mulf %71, %72 : vector<8x32xf32>
      %74 = vector.broadcast %53 : vector<1x32xf32> to vector<8x32xf32>
      %75 = arith.addf %73, %74 : vector<8x32xf32>
      %76 = arith.truncf %75 : vector<8x32xf32> to vector<8x32xbf16>
      %cst_46 = arith.constant 0.000000e+00 : f32
      %77 = vector.broadcast %cst_46 : f32 to vector<8x32xf32>
      %c0_47 = arith.constant 0 : index
      %c0_48 = arith.constant 0 : index
      %78 = vector.load %arg10[%c0_47, %c0_48] : memref<32x64xbf16, #tpu.memory_space<vmem>>, vector<32x64xbf16>
      %cst_49 = arith.constant dense<0.000000e+00> : vector<8x64xf32>
      %79 = tpu.matmul %76, %78, %cst_49 {dimension_numbers = #tpu.dot_dimension_numbers<[1], [0], [0], [1], [0, 0, 1, 1], [], []>} : vector<8x32xbf16>, vector<32x64xbf16>, vector<8x64xf32> -> vector<8x64xf32>
      %cst_50 = arith.constant 0.000000e+00 : f32
      %80 = vector.broadcast %cst_50 : f32 to vector<8x64xf32>
      %81 = arith.maximumf %79, %80 : vector<8x64xf32>
      %82 = arith.truncf %81 : vector<8x64xf32> to vector<8x64xbf16>
      %c0_51 = arith.constant 0 : index
      %c0_52 = arith.constant 0 : index
      %83 = vector.load %arg11[%c0_51, %c0_52] : memref<64x32xbf16, #tpu.memory_space<vmem>>, vector<64x32xbf16>
      %cst_53 = arith.constant dense<0.000000e+00> : vector<8x32xf32>
      %84 = tpu.matmul %82, %83, %cst_53 {dimension_numbers = #tpu.dot_dimension_numbers<[1], [0], [0], [1], [0, 0, 1, 1], [], []>} : vector<8x64xbf16>, vector<64x32xbf16>, vector<8x32xf32> -> vector<8x32xf32>
      %85 = arith.addf %77, %84 : vector<8x32xf32>
      %86 = arith.addf %85, %75 : vector<8x32xf32>
      %c0_54 = arith.constant 0 : index
      %c0_55 = arith.constant 0 : index
      %87 = vector.load %arg12[%c0_54, %c0_55] : memref<1x32xf32, #tpu.memory_space<vmem>>, vector<1x32xf32>
      %c0_56 = arith.constant 0 : index
      %c0_57 = arith.constant 0 : index
      %88 = vector.load %arg13[%c0_56, %c0_57] : memref<1x32xf32, #tpu.memory_space<vmem>>, vector<1x32xf32>
      %cst_58 = arith.constant dense<0.000000e+00> : vector<8xf32>
      %89 = vector.multi_reduction <add>, %86, %cst_58 [1] : vector<8x32xf32> to vector<8xf32>
      %90 = vector.shape_cast %89 : vector<8xf32> to vector<8x1xf32>
      %cst_59 = arith.constant 3.200000e+01 : f32
      %91 = vector.broadcast %cst_59 : f32 to vector<8x1xf32>
      %92 = arith.divf %90, %91 : vector<8x1xf32>
      %93 = vector.broadcast %92 : vector<8x1xf32> to vector<8x32xf32>
      %94 = arith.subf %86, %93 : vector<8x32xf32>
      %95 = arith.mulf %94, %94 : vector<8x32xf32>
      %cst_60 = arith.constant dense<0.000000e+00> : vector<8xf32>
      %96 = vector.multi_reduction <add>, %95, %cst_60 [1] : vector<8x32xf32> to vector<8xf32>
      %97 = vector.shape_cast %96 : vector<8xf32> to vector<8x1xf32>
      %cst_61 = arith.constant 3.200000e+01 : f32
      %98 = vector.broadcast %cst_61 : f32 to vector<8x1xf32>
      %99 = arith.divf %97, %98 : vector<8x1xf32>
      %100 = vector.broadcast %92 : vector<8x1xf32> to vector<8x32xf32>
      %101 = arith.subf %86, %100 : vector<8x32xf32>
      %cst_62 = arith.constant 9.99999974E-6 : f32
      %102 = vector.broadcast %cst_62 : f32 to vector<8x1xf32>
      %103 = arith.addf %99, %102 : vector<8x1xf32>
      %104 = math.rsqrt %103 : vector<8x1xf32>
      %105 = vector.broadcast %104 : vector<8x1xf32> to vector<8x32xf32>
      %106 = arith.mulf %101, %105 : vector<8x32xf32>
      %107 = vector.broadcast %87 : vector<1x32xf32> to vector<8x32xf32>
      %108 = arith.mulf %106, %107 : vector<8x32xf32>
      %109 = vector.broadcast %88 : vector<1x32xf32> to vector<8x32xf32>
      %110 = arith.addf %108, %109 : vector<8x32xf32>
      %c0_63 = arith.constant 0 : index
      %c0_64 = arith.constant 0 : index
      %c0_65 = arith.constant 0 : index
      %111 = vector.load %arg14[%c0_63, %c0_64, %c0_65] : memref<1x8x32xf32, #tpu.memory_space<vmem>>, vector<1x8x32xf32>
      %112 = vector.shape_cast %111 : vector<1x8x32xf32> to vector<8x32xf32>
      %113 = vector.shape_cast %110 : vector<8x32xf32> to vector<1x8x32xf32>
      tpu.vector_store %arg14[%c0_63, %c0_64, %c0_65], %113 {strides = array<i32>} : memref<1x8x32xf32, #tpu.memory_space<vmem>>, vector<1x8x32xf32>,
    } else {
    }
    return
  }
  func.func @transform_0(%arg0: i32, %arg1: i32) -> (i32, i32, i32) {
    %c0_i32 = arith.constant 0 : i32
    %c0_i32_0 = arith.constant 0 : i32
    %c0_i32_1 = arith.constant 0 : i32
    return %arg0, %c0_i32, %c0_i32_0 : i32, i32, i32
  }
  func.func @transform_1(%arg0: i32, %arg1: i32) -> (i32, i32, i32) {
    %c0_i32 = arith.constant 0 : i32
    %c0_i32_0 = arith.constant 0 : i32
    %c0_i32_1 = arith.constant 0 : i32
    return %arg0, %c0_i32, %c0_i32_0 : i32, i32, i32
  }
  func.func @transform_2(%arg0: i32, %arg1: i32) -> (i32, i32, i32) {
    %c0_i32 = arith.constant 0 : i32
    %c0_i32_0 = arith.constant 0 : i32
    %c0_i32_1 = arith.constant 0 : i32
    return %arg1, %c0_i32, %c0_i32_0 : i32, i32, i32
  }
  func.func @transform_3(%arg0: i32, %arg1: i32) -> (i32, i32, i32) {
    %c0_i32 = arith.constant 0 : i32
    %c0_i32_0 = arith.constant 0 : i32
    %c0_i32_1 = arith.constant 0 : i32
    return %arg1, %c0_i32, %c0_i32_0 : i32, i32, i32
  }
  func.func @transform_4(%arg0: i32, %arg1: i32) -> (i32, i32, i32) {
    %c0_i32 = arith.constant 0 : i32
    %c0_i32_0 = arith.constant 0 : i32
    %c0_i32_1 = arith.constant 0 : i32
    return %arg1, %c0_i32, %c0_i32_0 : i32, i32, i32
  }
  func.func @transform_5(%arg0: i32, %arg1: i32) -> (i32, i32, i32) {
    %c0_i32 = arith.constant 0 : i32
    %c0_i32_0 = arith.constant 0 : i32
    %c0_i32_1 = arith.constant 0 : i32
    return %arg1, %c0_i32, %c0_i32_0 : i32, i32, i32
  }
  func.func @transform_6(%arg0: i32, %arg1: i32) -> (i32, i32) {
    %c0_i32 = arith.constant 0 : i32
    %c0_i32_0 = arith.constant 0 : i32
    %c0_i32_1 = arith.constant 0 : i32
    return %c0_i32, %c0_i32_0 : i32, i32
  }
  func.func @transform_7(%arg0: i32, %arg1: i32) -> (i32, i32) {
    %c0_i32 = arith.constant 0 : i32
    %c0_i32_0 = arith.constant 0 : i32
    %c0_i32_1 = arith.constant 0 : i32
    return %c0_i32, %c0_i32_0 : i32, i32
  }
  func.func @transform_8(%arg0: i32, %arg1: i32) -> (i32, i32) {
    %c0_i32 = arith.constant 0 : i32
    %c0_i32_0 = arith.constant 0 : i32
    %c0_i32_1 = arith.constant 0 : i32
    return %c0_i32, %c0_i32_0 : i32, i32
  }
  func.func @transform_9(%arg0: i32, %arg1: i32) -> (i32, i32) {
    %c0_i32 = arith.constant 0 : i32
    %c0_i32_0 = arith.constant 0 : i32
    %c0_i32_1 = arith.constant 0 : i32
    return %c0_i32, %c0_i32_0 : i32, i32
  }
  func.func @transform_10(%arg0: i32, %arg1: i32) -> (i32, i32) {
    %c0_i32 = arith.constant 0 : i32
    %c0_i32_0 = arith.constant 0 : i32
    %c0_i32_1 = arith.constant 0 : i32
    return %c0_i32, %c0_i32_0 : i32, i32
  }
  func.func @transform_11(%arg0: i32, %arg1: i32) -> (i32, i32) {
    %c0_i32 = arith.constant 0 : i32
    %c0_i32_0 = arith.constant 0 : i32
    %c0_i32_1 = arith.constant 0 : i32
    return %c0_i32, %c0_i32_0 : i32, i32
  }
  func.func @transform_12(%arg0: i32, %arg1: i32) -> (i32, i32, i32) {
    %c0_i32 = arith.constant 0 : i32
    %c0_i32_0 = arith.constant 0 : i32
    %c0_i32_1 = arith.constant 0 : i32
    return %arg0, %c0_i32, %c0_i32_0 : i32, i32, i32
  }
  func.func @transform_13(%arg0: i32, %arg1: i32) -> (i32, i32, i32, i32) {
    %c0_i32 = arith.constant 0 : i32
    %c0_i32_0 = arith.constant 0 : i32
    %c0_i32_1 = arith.constant 0 : i32
    return %arg0, %arg1, %c0_i32, %c0_i32_0 : i32, i32, i32, i32
  }
}

</mosaic_0001>

<bundles_post_ra>
// kernel: tpu_custom_call.1
= control target key start
LH: loop header
LB: loop body
LE: loop exit
PB: predicated region body
PF: predicated region fallthrough
CT: control target
= control target key end

     0   :  { %s3474_s0 = inlined_call_operand.hbm [shape: f32[2,8,32], index: 0, kind: input, shape index: {}]   ;;  %s3475_s1 = inlined_call_operand.hbm [shape: bf16[2,8,8], index: 1, kind: input, shape index: {}]   ;;  %s3476_s2 = inlined_call_operand.hbm [shape: bf16[4,32,16], index: 2, kind: input, shape index: {}]   ;;  %s3477_s3 = inlined_call_operand.hbm [shape: bf16[4,32,16], index: 3, kind: input, shape index: {}]   ;;  %s3478_s4 = inlined_call_operand.hbm [shape: bf16[4,32,16], index: 4, kind: input, shape index: {}]   ;;  %s3479_s5 = inlined_call_operand.hbm [shape: bf16[4,16,32], index: 5, kind: input, shape index: {}]   ;;  %s3480_s6 = inlined_call_operand.hbm [shape: f32[1,32], index: 6, kind: input, shape index: {}]   ;;  %s3481_s7 = inlined_call_operand.hbm [shape: f32[1,32], index: 7, kind: input, shape index: {}]   ;;  %s3482_s8 = inlined_call_operand.hbm [shape: bf16[32,64], index: 8, kind: input, shape index: {}]   ;;  %s3483_s9 = inlined_call_operand.hbm [shape: bf16[64,32], index: 9, kind: input, shape index: {}]   ;;  %s3484_s10 = inlined_call_operand.hbm [shape: f32[1,32], index: 10, kind: input, shape index: {}]   ;;  %s3485_s11 = inlined_call_operand.hbm [shape: f32[1,32], index: 11, kind: input, shape index: {}]   ;;  %s3486_s12 = inlined_call_operand.hbm [shape: f32[2,8,32], index: 12, kind: output, shape index: {0}]   ;;  %s3487_s13 = inlined_call_operand.hbm [shape: f32[2,4,8,8], index: 13, kind: output, shape index: {1}]  }
   0x1   :  { %3548 = sst [smem:[#allocation58_spill]] %s3474_s0 }
   0x2   :  { %3549 = sst [smem:[#allocation59_spill]] %s3475_s1 }
   0x3   :  { %3550 = sst [smem:[#allocation60_spill]] %s3476_s2 }
   0x4   :  { %3551 = sst [smem:[#allocation61_spill]] %s3477_s3 }
   0x5   :  { %3552 = sst [smem:[#allocation62_spill]] %s3478_s4 }
   0x6   :  { %3553 = sst [smem:[#allocation63_spill]] %s3479_s5 }
   0x7   :  { %3554 = sst [smem:[#allocation64_spill]] %s3480_s6 }
   0x8   :  { %3555 = sst [smem:[#allocation65_spill]] %s3481_s7 }
   0x9   :  { %3556 = sst [smem:[#allocation66_spill]] %s3482_s8 }
   0xa   :  { %3557 = sst [smem:[#allocation67_spill]] %s3483_s9 }
   0xb   :  { %3558 = sst [smem:[#allocation68_spill]] %s3484_s10 }
   0xc   :  { %3559 = sst [smem:[#allocation69_spill]] %s3485_s11 }
   0xd   :  { %3560 = sst [smem:[#allocation70_spill]] %s3486_s12 }
   0xe   :  { %3561 = sst [smem:[#allocation71_spill]] %s3487_s13 }
   0xf   :  { %19 = vsyncpa [#allocation4], 0 }
  0x10   :  { %21 = vsyncpa [#allocation4 + $0x1], 0 }
  0x11   :  { %22 = vsyncpa [#allocation7], 0 }
  0x12   :  { %24 = vsyncpa [#allocation7 + $0x1], 0 }
  0x13   :  { %25 = vsyncpa [#allocation10], 0 }
  0x14   :  { %27 = vsyncpa [#allocation10 + $0x1], 0 }
  0x15   :  { %28 = vsyncpa [#allocation13], 0 }
  0x16   :  { %30 = vsyncpa [#allocation13 + $0x1], 0 }
  0x17   :  { %31 = vsyncpa [#allocation16], 0 }
  0x18   :  { %32 = vsyncpa [#allocation19], 0 }
  0x19   :  { %33 = vsyncpa [#allocation22], 0 }
  0x1a   :  { %34 = vsyncpa [#allocation5], 0 }
  0x1b   :  { %36 = vsyncpa [#allocation5 + $0x1], 0 }
  0x1c   :  { %37 = vsyncpa [#allocation25], 0 }
  0x1d   :  { %39 = vsyncpa [#allocation25 + $0x1], 0  ;;  %s2680_s25 = smov 0   ;;  %s2682_s26 = smov 0  }
  0x1e   :  { %s2684_s27 = smov 0   ;;  %s2686_s28 = smov 0  }
  0x1f   :  { %s2688_s29 = smov 0   ;;  %s2690_s30 = smov 0  }
  0x20   :  { %s2692_s14 = smov 0   ;;  %s2694_s15 = smov 0  }
  0x21   :  { %s2696_s16 = smov 0   ;;  %s2698_s17 = smov 0  }
  0x22   :  { %s2700_s18 = smov 0   ;;  %s2702_s19 = smov 0  }
  0x23   :  { %s2704_s20 = smov 0   ;;  %s2706_s21 = smov 0  }
  0x24 LB: > { %3562 = sst [smem:[#allocation37_spill]] %s2535_s25  ;;  %s2751_s22 = sadd.s32 4294967295, %s2587_s21   ;;  %s2587_s21 = sphi %s2706_s21, %s45_s21   ;;  %s2583_s20 = sphi %s2704_s20, %s3684_s20   ;;  %s2579_s19 = sphi %s2702_s19, %s3683_s19   ;;  %s2575_s18 = sphi %s2700_s18, %s3682_s18   ;;  %s2571_s17 = sphi %s2698_s17, %s3681_s17   ;;  %s2567_s16 = sphi %s2696_s16, %s3674_s16   ;;  %s2563_s15 = sphi %s2694_s15, %s3680_s15   ;;  %s2559_s14 = sphi %s2692_s14, %s3679_s14   ;;  %s2555_s30 = sphi %s2690_s30, %s3678_s30   ;;  %s2551_s29 = sphi %s2688_s29, %s3677_s29   ;;  %s2547_s28 = sphi %s2686_s28, %s3671_s28   ;;  %s2543_s27 = sphi %s2684_s27, %s3670_s27   ;;  %s2539_s26 = sphi %s2682_s26, %s3669_s26   ;;  %s2535_s25 = sphi %s2680_s25, %s3668_s25  }
  0x25   : > { %3563 = sst [smem:[#allocation38_spill]] %s2539_s26  ;;  %p1622_p0 = scmp.ge.s32.totalorder %s2587_s21, 1 }
  0x26   : > { %3564 = sst [smem:[#allocation39_spill]] %s2543_s27  ;;  %p3498_p1 = scmp.eq.s32.totalorder %s2751_s22, 0 }
  0x27   : > { %3565 = sst [smem:[#allocation40_spill]] %s2551_s29  ;;  %p398_p2 = scmp.lt.s32.totalorder %s2587_s21, 9 }
  0x28   : > { %3566 = sst [smem:[#allocation41_spill]] %s2559_s14  ;;  %s2589_s24 = smov [#allocation14]  }
  0x29   : > { %3567 = sst [smem:[#allocation42_spill]] %s2567_s16  ;;  %p2756_p3 = pnand %p1622_p0, %p398_p2 }
  0x2a   : > { %3568 = sst [smem:[#allocation43_spill]] %s2571_s17  ;;  %s411_s13 = sshll.u32 %s2589_s24, 4  ;;  %s412_s13 = int_to_ptr.vmem [resolvable:$true] %s411_s13 }
  0x2b   : > { %3569 = sst [smem:[#allocation44_spill]] %s2575_s18  ;;  %p1824_p4 = pneg %p2756_p3 }
  0x2c   : > { %3570 = sst [smem:[#allocation45_spill]] %s2587_s21  ;;  %s2590_s12 = smov [#allocation15]  }
  0x2d   : > { %3571 = sst [smem:[#allocation46_spill]] %s2751_s22  ;;  %s422_s18 = sshll.u32 %s2590_s12, 4  ;;  %s2768_s18 = int_to_ptr.vmem [resolvable:$true] %s422_s18 }
  0x2e   : > { %s3572_s23 = scalar_select %p2756_p3, 1, 0 }
  0x2f   : > { %p2764_p5 = pnand %p1824_p4, %p3498_p1  ;;  %s2591_s5 = smov [#allocation18]  }
  0x30   : > { %3573 = sst [smem:[#allocation47_spill]] %s3572_s23  ;;  %s2770_s4 = sshll.u32 %s2591_s5, 4  ;;  %s446_s4 = int_to_ptr.vmem [resolvable:$true] %s2770_s4 }
  0x31   : > { %s3574_s17 = scalar_select %p2764_p5, 1, 0 }
  0x32   : > { %s3575_s6 = sld [smem:[#allocation64_spill]]  ;;  %p2780_p7 = pneg %p2764_p5 }
  0x34   : > { %s3576_s12 = scalar_select %p2780_p7, 1, 0 }
  0x38   : > { %s2029_s24 = scalar_lea.hbm %s3575_s6, 16 }
  0x39   : > { %p2030_p6 = scmp.ne.s32.totalorder %s3575_s6, %s2029_s24  ;;  %p2036_p10 = scmp.lt.u32.totalorder %s2029_s24, %s3575_s6 }
  0x3b   : > { %p2032_p8 = pnand %p2780_p7, %p2030_p6 }
  0x3d   : > { %p2033_p9 = pneg %p2032_p8 }
  0x3f   : > { %p2038_p11 = pnand %p2036_p10, %p2033_p9 }
  0x41   : > { %2041 = shalt.err (!%p2038_p11)
}
  0x42   : > { %s2042_s0 = scalar_lea.vmem %s412_s13, 16  ;;  %s2049_s2 = scalar_lea.vmem %s412_s13, 32 }
  0x43   : > { %p2043_p12 = scmp.ne.s32.totalorder %s412_s13, %s2042_s0  ;;  %p2050_p2 = scmp.lt.s32.totalorder %s412_s13, %s412_s13 }
  0x44   : > { %p2051_p4 = scmp.lt.s32.totalorder %s2049_s2, %s2042_s0 }
  0x45   : > { %p2045_p13 = pnand %p2043_p12, %p2780_p7 }
  0x46   : > { %p2052_p1 = por %p2051_p4, %p2050_p2 }
  0x47   : > { %p2046_p0 = pneg %p2045_p13 }
  0x49   : > { %p2053_p3 = pnand %p2052_p1, %p2046_p0 }
  0x4b   : > { %2056 = shalt.err (!%p2053_p3)
}
  0x4c   : > { %1827 = dma.hbm_to_vmem [thread:$0]  (!%p2764_p5), %s3575_s6, 16, %s412_s13, [#allocation13]  }
  0x4d   : > { %s3577_s7 = sld [smem:[#allocation65_spill]] }
  0x53   : > { %s2057_s5 = scalar_lea.hbm %s3577_s7, 16 }
  0x54   : > { %p2058_p6 = scmp.ne.s32.totalorder %s3577_s7, %s2057_s5  ;;  %p2064_p1 = scmp.lt.u32.totalorder %s2057_s5, %s3577_s7 }
  0x56   : > { %p2060_p8 = pnand %p2058_p6, %p2780_p7 }
  0x58   : > { %p2061_p9 = pneg %p2060_p8 }
  0x5a   : > { %p2066_p3 = pnand %p2064_p1, %p2061_p9 }
  0x5c   : > { %2069 = shalt.err (!%p2066_p3)
}
  0x5d   : > { %s2070_s13 = scalar_lea.vmem %s2768_s18, 16  ;;  %s2077_s3 = scalar_lea.vmem %s2768_s18, 32 }
  0x5e   : > { %p2071_p10 = scmp.ne.s32.totalorder %s2768_s18, %s2070_s13  ;;  %p2078_p13 = scmp.lt.s32.totalorder %s2768_s18, %s2768_s18 }
  0x5f   : > { %p2079_p0 = scmp.lt.s32.totalorder %s2077_s3, %s2070_s13 }
  0x60   : > { %p2073_p11 = pnand %p2071_p10, %p2780_p7 }
  0x61   : > { %p2080_p2 = por %p2079_p0, %p2078_p13 }
  0x62   : > { %p2074_p12 = pneg %p2073_p11 }
  0x64   : > { %p2081_p4 = pnand %p2080_p2, %p2074_p12 }
  0x66   : > { %2084 = shalt.err (!%p2081_p4)
}
  0x67   : > { %1830 = dma.hbm_to_vmem [thread:$0]  (!%p2764_p5), %s3577_s7, 16, %s2768_s18, [#allocation16]  }
  0x68   : > { %s3578_s9 = sld [smem:[#allocation67_spill]] }
  0x6e   : > { %s2085_s24 = scalar_lea.hbm %s3578_s9, 512 }
  0x6f   : > { %p2086_p6 = scmp.ne.s32.totalorder %s3578_s9, %s2085_s24  ;;  %p2092_p1 = scmp.lt.u32.totalorder %s2085_s24, %s3578_s9 }
  0x71   : > { %p2088_p8 = pnand %p2086_p6, %p2780_p7 }
  0x73   : > { %p2089_p9 = pneg %p2088_p8 }
  0x75   : > { %p2094_p3 = pnand %p2092_p1, %p2089_p9 }
  0x77   : > { %2097 = shalt.err (!%p2094_p3)
}
  0x78   : > { %s2098_s3 = scalar_lea.vmem %s446_s4, 512  ;;  %p2106_p13 = scmp.lt.s32.totalorder %s446_s4, %s446_s4 }
  0x79   : > { %p2099_p10 = scmp.ne.s32.totalorder %s446_s4, %s2098_s3  ;;  %p2107_p0 = scmp.lt.s32.totalorder %s2098_s3, %s2098_s3 }
  0x7b   : > { %p2101_p11 = pnand %p2099_p10, %p2780_p7  ;;  %p2108_p2 = por %p2107_p0, %p2106_p13 }
  0x7d   : > { %p2102_p12 = pneg %p2101_p11 }
  0x7f   : > { %p2109_p4 = pnand %p2108_p2, %p2102_p12 }
  0x81   : > { %2112 = shalt.err (!%p2109_p4)
}
  0x82   : > { %s3502_s18 = smov 64   ;;  %s3504_s8 = smov 4  }
  0x83   : > { %1836 = dma.hbm_to_vmem [thread:$0]  (!%p2764_p5), %s3578_s9, 512, %s446_s4, [#allocation19], %s3502_s18, %s3502_s18, %s3504_s8  }
  0x84   : > { %s1621_s10 = sadd.s32 4294967294, %s2587_s21   ;;  %s54_s24 = sadd.s32 1, %s2579_s19 }
  0x85   : > { %s57_s5 = sadd.s32 1, %s2583_s20  ;;  %p55_p6 = scmp.ge.s32.totalorder %s54_s24, 4 }
  0x86   : > { %s64_s0 = sadd.s32 1, %s2567_s16  ;;  %p3507_p8 = scmp.ne.s32.totalorder %s2567_s16, %s2563_s15 }
  0x87   : > { %p72_p9 = scmp.eq.s32.totalorder %s2587_s21, 0  ;;  %s3686_s24 = smov (%p55_p6, %s54_s24), 0 }
  0x88   : > { %3579 = sst [smem:[#allocation48_spill]] %s3686_s24  ;;  %s3688_s5 = smov (!%p55_p6, %s57_s5), %s2583_s20 }
  0x89   : > { %p2857_p1 = por %p72_p9, %p3507_p8  ;;  %p3506_p3 = scmp.ne.s32.totalorder %s2563_s15, %s2559_s14 }
  0x8a   : > { %p59_p10 = scmp.ge.s32.totalorder %s3688_s5, 2  ;;  %s113_s2 = ssub.s32 %s2579_s19, %s3686_s24 }
  0x8b   : > { %p3581_p11 = scmp.eq.s32.totalorder %s2751_s22, 0  ;;  %p114_p13 = scmp.eq.s32.totalorder %s113_s2, 0 }
  0x8c   : > { %s3690_s5 = smov (%p59_p10, %s3688_s5), 0  ;;  %s116_s3 = sadd.s32 1, %s2555_s30 }
  0x8d   : > { %p2870_p12 = por %p3581_p11, %p3506_p3  ;;  %3583 = sst [smem:[#allocation49_spill]] %s3690_s5 }
  0x8e   : > { %p123_p0 = scmp.ne.s32.totalorder %s2555_s30, %s2551_s29  ;;  %s61_s11 = ssub.s32 %s2583_s20, %s3690_s5 }
  0x8f   : > { %s3582_s13 = scalar_select %p2870_p12, 1, 0 }
  0x90   : > { %p129_p2 = scmp.ne.s32.totalorder %s2551_s29, %s2547_s28  ;;  %p62_p4 = scmp.eq.s32.totalorder %s61_s11, 0 }
  0x91   : > { %p2885_p6 = por %p123_p0, %p72_p9  ;;  %p3587_p10 = pmov %p3581_p11 }
  0x92   : > { %s2890_s18 = scalar_select %p114_p13, %s2555_s30, %s116_s3  }
  0x93   : > { %s2893_s8 = scalar_select %p62_p4, %s2567_s16, %s64_s0  }
  0x94   : > { %3585 = sst [smem:[#allocation50_spill]] %s2890_s18  ;;  %p2897_p11 = por %p129_p2, %p3587_p10 }
  0x95   : > { %3586 = sst [smem:[#allocation51_spill]] %s2893_s8  ;;  %p357_p3 = scmp.eq.s32.totalorder %s2751_s22, 7 }
  0x96   : > { %s3588_s6 = scalar_select %p2897_p11, 1, 0 }
  0x97   : > { %p363_p8 = scmp.eq.s32.totalorder %s1621_s10, 7  ;;  %s371_s28 = sor.u32 %s113_s2, %s61_s11 }
  0x98   : > { %3589 = sst [smem:[#allocation52_spill]] %s3588_s6  ;;  %p3590_p9 = scmp.ne.s32.totalorder %s2567_s16, %s2563_s15 }
  0x99   : > { %p372_p13 = scmp.eq.s32.totalorder %s371_s28, 0  ;;  %p3593_p4 = scmp.ne.s32.totalorder %s2563_s15, %s2559_s14 }
  0x9a   : > { %p2905_p0 = por %p357_p3, %p3590_p9  ;;  %s374_s3 = sadd.s32 1, %s2543_s27 }
  0x9b   : > { %p2912_p12 = por %p363_p8, %p3593_p4  ;;  %p384_p2 = scmp.ne.s32.totalorder %s2543_s27, %s2539_s26 }
  0x9c   : > { %s3591_s7 = scalar_select %p2905_p0, 1, 0 }
  0x9d   : > { %s3594_s0 = scalar_select %p2912_p12, 1, 0 }
  0x9e   : > { %3592 = sst [smem:[#allocation53_spill]] %s3591_s7  ;;  %p390_p10 = scmp.ne.s32.totalorder %s2539_s26, %s2535_s25 }
  0x9f   : > { %3595 = sst [smem:[#allocation54_spill]] %s3594_s0  ;;  %p3517_p11 = scmp.lt.s32.totalorder %s2587_s21, 8 }
  0xa0   : > { %s2918_s9 = scalar_select %p372_p13, %s2543_s27, %s374_s3  }
  0xa1   : > { %s2926_s10 = sand.u32 1, %s2567_s16   ;;  %p2928_p5 = por %p384_p2, %p357_p3 }
  0xa2   : > { %3596 = sst [smem:[#allocation55_spill]] %s2918_s9  ;;  %p2932_p9 = por %p390_p10, %p363_p8 }
  0xa3   : > { %s3597_s2 = scalar_select %p2928_p5, 1, 0 }
  0xa4   : > { %s3599_s11 = scalar_select %p2932_p9, 1, 0 }
  0xa5   : > { %3598 = sst [smem:[#allocation56_spill]] %s3597_s2  ;;  %p2940_p4 = pnand %p3517_p11, %p2857_p1 }
  0xa6   : > { %3600 = sst [smem:[#allocation57_spill]] %s3599_s11  ;;  %s2945_s3 = sand.u32 1, %s2587_s21  }
  0xa7   : > { %s3601_s28 = scalar_select %p2940_p4, 1, 0 }
  0xa8   : > { %s1632_s5 = sshll.u32 %s2926_s10, 2  ;;  %s1633_s24 = sshll.u32 %s2583_s20, 6 }
  0xa9   : > { %s503_s8 = scalar_lea.vmem [#allocation6], %s1632_s5  ;;  %s3602_s1 = sld [smem:[#allocation59_spill]] }
  0xaa   : > { %s510_s16 = sshll.u32 %s503_s8, 4  ;;  %p3526_p1 = pneg %p2940_p4  ;;  %s2954_s16 = int_to_ptr.vmem [resolvable:$true] %s510_s16 }
  0xaf   : > { %s2952_s27 = scalar_lea.hbm %s3602_s1, %s1633_s24  ;;  %s2118_s9 = scalar_lea.hbm %s3602_s1, 128 }
  0xb0   : > { %s2113_s11 = scalar_lea.hbm %s2952_s27, 64  ;;  %p2119_p2 = scmp.lt.u32.totalorder %s2952_s27, %s3602_s1 }
  0xb1   : > { %p2114_p8 = scmp.ne.s32.totalorder %s2952_s27, %s2113_s11  ;;  %p2120_p10 = scmp.lt.u32.totalorder %s2118_s9, %s2113_s11 }
  0xb2   : > { %p2122_p9 = scmp.lt.u32.totalorder %s2113_s11, %s2952_s27 }
  0xb3   : > { %p2116_p3 = pnand %p3526_p1, %p2114_p8  ;;  %p2121_p11 = por %p2120_p10, %p2119_p2 }
  0xb5   : > { %p2117_p13 = pneg %p2116_p3  ;;  %p2123_p12 = por %p2122_p9, %p2121_p11 }
  0xb7   : > { %p2124_p5 = pnand %p2123_p12, %p2117_p13 }
  0xb9   : > { %2127 = shalt.err (!%p2124_p5)
}
  0xba   : > { %s2128_s4 = scalar_lea.vmem %s2954_s16, 64  ;;  %s2594_s8 = smov [#allocation6]  }
  0xbb   : > { %p2129_p8 = scmp.ne.s32.totalorder %s2954_s16, %s2128_s4  ;;  %s2133_s5 = sshll.u32 %s2594_s8, 4  ;;  %s2134_s5 = int_to_ptr.vmem [resolvable:$false] %s2133_s5 }
  0xbc   : > { %s2135_s18 = scalar_lea.vmem %s2134_s5, 128  ;;  %p2136_p7 = scmp.lt.s32.totalorder %s2954_s16, %s2134_s5 }
  0xbd   : > { %p2131_p3 = pnand %p2129_p8, %p3526_p1  ;;  %p2137_p2 = scmp.lt.s32.totalorder %s2135_s18, %s2128_s4 }
  0xbf   : > { %p2132_p0 = pneg %p2131_p3  ;;  %p2138_p10 = por %p2137_p2, %p2136_p7 }
  0xc1   : > { %p2139_p11 = pnand %p2138_p10, %p2132_p0 }
  0xc3   : > { %2142 = shalt.err (!%p2139_p11)
}
  0xc4   : > { %s3603_s11 = scalar_lea.sflag [#allocation7], %s2945_s3  ;;  %p3604_p5 = scmp.lt.s32.totalorder %s2587_s21, 8 }
  0xc5   : > { %1849 = dma.hbm_to_vmem [thread:$0]  (!%p2940_p4), %s2952_s27, 64, %s2954_s16, %s3603_s11  }
  0xc6   : > { %p2988_p12 = pnand %p3604_p5, %p2885_p6  ;;  %s3523_s9 = sand.u32 1, %s2555_s30  }
  0xc7   : > { %s2995_s24 = sshll.u32 %s3523_s9, 4  ;;  %s2998_s8 = sshll.u32 %s2579_s19, 8 }
  0xc8   : > { %s3605_s4 = scalar_select %p2988_p12, 1, 0 }
  0xc9   : > { %s3606_s1 = sld [smem:[#allocation61_spill]]  ;;  %s542_s27 = scalar_lea.vmem [#allocation9], %s2995_s24 }
  0xca   : > { %s549_s16 = sshll.u32 %s542_s27, 4  ;;  %p3014_p6 = pneg %p2988_p12  ;;  %s3007_s16 = int_to_ptr.vmem [resolvable:$true] %s549_s16 }
  0xcc   : > { %s3607_s9 = scalar_select %p3014_p6, 1, 0 }
  0xcf   : > { %s3004_s25 = scalar_lea.hbm %s3606_s1, %s2998_s8  ;;  %s2148_s0 = scalar_lea.hbm %s3606_s1, 1024 }
  0xd0   : > { %s2143_s11 = scalar_lea.hbm %s3004_s25, 256  ;;  %p2149_p13 = scmp.lt.u32.totalorder %s3004_s25, %s3606_s1 }
  0xd1   : > { %p2144_p7 = scmp.ne.s32.totalorder %s3004_s25, %s2143_s11  ;;  %p2150_p8 = scmp.lt.u32.totalorder %s2148_s0, %s2143_s11 }
  0xd2   : > { %p2152_p2 = scmp.lt.u32.totalorder %s2143_s11, %s3004_s25 }
  0xd3   : > { %p2146_p0 = pnand %p3014_p6, %p2144_p7  ;;  %p2151_p3 = por %p2150_p8, %p2149_p13 }
  0xd5   : > { %p2147_p9 = pneg %p2146_p0  ;;  %p2153_p10 = por %p2152_p2, %p2151_p3 }
  0xd7   : > { %p2154_p11 = pnand %p2153_p10, %p2147_p9 }
  0xd9   : > { %2157 = shalt.err (!%p2154_p11)
}
  0xda   : > { %s2158_s23 = scalar_lea.vmem %s3007_s16, 256  ;;  %s2595_s5 = smov [#allocation9]  }
  0xdb   : > { %p2159_p5 = scmp.ne.s32.totalorder %s3007_s16, %s2158_s23  ;;  %s2163_s18 = sshll.u32 %s2595_s5, 4  ;;  %s2164_s18 = int_to_ptr.vmem [resolvable:$false] %s2163_s18 }
  0xdc   : > { %s2165_s14 = scalar_lea.vmem %s2164_s18, 512  ;;  %p2166_p1 = scmp.lt.s32.totalorder %s3007_s16, %s2164_s18 }
  0xdd   : > { %p2161_p7 = pnand %p2159_p5, %p3014_p6  ;;  %p2167_p4 = scmp.lt.s32.totalorder %s2165_s14, %s2158_s23 }
  0xdf   : > { %p2162_p0 = pneg %p2161_p7  ;;  %p2168_p13 = por %p2167_p4, %p2166_p1 }
  0xe1   : > { %p2169_p8 = pnand %p2168_p13, %p2162_p0 }
  0xe3   : > { %2172 = shalt.err (!%p2169_p8)
}
  0xe4   : > { %s3608_s0 = smov 4   ;;  %s3609_s11 = smov 64  }
  0xe5   : > { %s3610_s27 = scalar_lea.sflag [#allocation10], %s2945_s3  ;;  %s2596_s1 = smov [#allocation17]  }
  0xe6   : > { %1855 = dma.hbm_to_vmem [thread:$0]  (!%p2988_p12), %s3004_s25, 256, %s3007_s16, %s3610_s27, %s3609_s11, %s3609_s11, %s3608_s0  }
  0xe7   : > { %s432_s5 = sshll.u32 %s2596_s1, 4  ;;  %s2597_s21 = smov [#allocation20]   ;;  %s433_s5 = int_to_ptr.vmem [resolvable:$true] %s432_s5 }
  0xe8   : > { %s459_s18 = sshll.u32 %s2597_s21, 4  ;;  %s3611_s2 = sld [smem:[#allocation66_spill]]  ;;  %s460_s18 = int_to_ptr.vmem [resolvable:$true] %s459_s18 }
  0xe9   : > { %p3612_p1 = scmp.ne.s32.totalorder %s3576_s12, 0 }
  0xee   : > { %s2173_s7 = scalar_lea.hbm %s3611_s2, 256 }
  0xef   : > { %p2174_p4 = scmp.ne.s32.totalorder %s3611_s2, %s2173_s7  ;;  %p2180_p2 = scmp.lt.u32.totalorder %s2173_s7, %s3611_s2 }
  0xf1   : > { %p2176_p9 = pnand %p2174_p4, %p3612_p1 }
  0xf3   : > { %p2177_p3 = pneg %p2176_p9 }
  0xf5   : > { %p2182_p10 = pnand %p2180_p2, %p2177_p3 }
  0xf7   : > { %2185 = shalt.err (!%p2182_p10)
}
  0xf8   : > { %s2186_s1 = scalar_lea.vmem %s433_s5, 256  ;;  %p2194_p0 = scmp.lt.s32.totalorder %s433_s5, %s433_s5 }
  0xf9   : > { %p2187_p11 = scmp.ne.s32.totalorder %s433_s5, %s2186_s1  ;;  %p2195_p13 = scmp.lt.s32.totalorder %s2186_s1, %s2186_s1 }
  0xfb   : > { %p2189_p5 = pnand %p2187_p11, %p3612_p1  ;;  %p2196_p8 = por %p2195_p13, %p2194_p0 }
  0xfd   : > { %p2190_p7 = pneg %p2189_p5 }
  0xff   : > { %p2197_p12 = pnand %p2196_p8, %p2190_p7 }
 0x101   : > { %2200 = shalt.err (!%p2197_p12)
}
 0x102   : > { %p3613_p4 = scmp.ne.s32.totalorder %s3574_s17, 0  ;;  %s3614_s29 = sld [smem:[#allocation68_spill]] }
 0x104   : > { %1833 = dma.hbm_to_vmem [thread:$0]  (!%p3613_p4), %s3611_s2, 256, %s433_s5, [#allocation16], %s3609_s11, %s3609_s11, %s3608_s0  }
 0x108   : > { %s3615_s22 = smov %s3614_s29  ;;  %s2201_s21 = scalar_lea.hbm %s3614_s29, 16 }
 0x109   : > { %p2202_p9 = scmp.ne.s32.totalorder %s3615_s22, %s2201_s21  ;;  %p2208_p2 = scmp.lt.u32.totalorder %s2201_s21, %s3615_s22 }
 0x10b   : > { %p2204_p12 = pnand %p2202_p9, %p3612_p1 }
 0x10d   : > { %p2205_p3 = pneg %p2204_p12 }
 0x10f   : > { %p2210_p10 = pnand %p2208_p2, %p2205_p3 }
 0x111   : > { %2213 = shalt.err (!%p2210_p10)
}
 0x112   : > { %s2214_s1 = scalar_lea.vmem %s460_s18, 16  ;;  %s2221_s5 = scalar_lea.vmem %s460_s18, 32 }
 0x113   : > { %p2215_p11 = scmp.ne.s32.totalorder %s460_s18, %s2214_s1  ;;  %p2222_p0 = scmp.lt.s32.totalorder %s460_s18, %s460_s18 }
 0x114   : > { %p2223_p13 = scmp.lt.s32.totalorder %s2221_s5, %s2214_s1 }
 0x115   : > { %p2217_p5 = pnand %p2215_p11, %p3612_p1 }
 0x116   : > { %p2224_p8 = por %p2223_p13, %p2222_p0 }
 0x117   : > { %p2218_p7 = pneg %p2217_p5 }
 0x119   : > { %p2225_p6 = pnand %p2224_p8, %p2218_p7 }
 0x11b   : > { %2228 = shalt.err (!%p2225_p6)
}
 0x11c   : > { %1839 = dma.hbm_to_vmem [thread:$0]  (!%p3613_p4), %s3615_s22, 16, %s460_s18, [#allocation19]  }
 0x11d   : > { %s2598_s25 = smov [#allocation21]   ;;  %s1630_s29 = sshll.u32 %s2926_s10, 3 }
 0x11e   : > { %s470_s26 = sshll.u32 %s2598_s25, 4  ;;  %s3616_s27 = sld [smem:[#allocation69_spill]]  ;;  %s471_s26 = int_to_ptr.vmem [resolvable:$true] %s470_s26 }
 0x124   : > { %s3617_s23 = smov %s3616_s27  ;;  %s2229_s14 = scalar_lea.hbm %s3616_s27, 16 }
 0x125   : > { %p2230_p6 = scmp.ne.s32.totalorder %s3617_s23, %s2229_s14  ;;  %p2236_p3 = scmp.lt.u32.totalorder %s2229_s14, %s3617_s23 }
 0x127   : > { %p2232_p9 = pnand %p2230_p6, %p3612_p1 }
 0x129   : > { %p2233_p12 = pneg %p2232_p9 }
 0x12b   : > { %p2238_p2 = pnand %p2236_p3, %p2233_p12 }
 0x12d   : > { %2241 = shalt.err (!%p2238_p2)
}
 0x12e   : > { %s2242_s18 = scalar_lea.vmem %s471_s26, 16  ;;  %s2249_s7 = scalar_lea.vmem %s471_s26, 32 }
 0x12f   : > { %p2243_p10 = scmp.ne.s32.totalorder %s471_s26, %s2242_s18  ;;  %p2250_p7 = scmp.lt.s32.totalorder %s471_s26, %s471_s26 }
 0x130   : > { %p2251_p0 = scmp.lt.s32.totalorder %s2249_s7, %s2242_s18 }
 0x131   : > { %p2245_p11 = pnand %p2243_p10, %p3612_p1 }
 0x132   : > { %p2252_p13 = por %p2251_p0, %p2250_p7 }
 0x133   : > { %p2246_p5 = pneg %p2245_p11 }
 0x135   : > { %p2253_p8 = pnand %p2252_p13, %p2246_p5 }
 0x137   : > { %2256 = shalt.err (!%p2253_p8)
}
 0x138   : > { %1842 = dma.hbm_to_vmem [thread:$0]  (!%p3613_p4), %s3617_s23, 16, %s471_s26, [#allocation22]  }
 0x139   : > { %s1631_s2 = sshll.u32 %s2583_s20, 7  ;;  %s3618_s27 = sld [smem:[#allocation58_spill]] }
 0x13a   : > { %s485_s5 = scalar_lea.vmem [#allocation3], %s1630_s29  ;;  %s482_s17 = scalar_lea.sflag [#allocation4], %s2926_s10 }
 0x13b   : > { %s492_s6 = sshll.u32 %s485_s5, 4  ;;  %p3620_p6 = scmp.ne.s32.totalorder %s3601_s28, 0  ;;  %s493_s6 = int_to_ptr.vmem [resolvable:$true] %s492_s6 }
 0x13d   : > { %p3621_p9 = pneg %p3620_p6 }
 0x13f   : > { %s3619_s1 = smov %s3618_s27  ;;  %s3104_s14 = scalar_lea.hbm %s3618_s27, %s1631_s2 }
 0x140   : > { %s2257_s18 = scalar_lea.hbm %s3104_s14, 128  ;;  %s2262_s25 = scalar_lea.hbm %s3619_s1, 256 }
 0x141   : > { %p2258_p1 = scmp.ne.s32.totalorder %s3104_s14, %s2257_s18  ;;  %p2263_p3 = scmp.lt.u32.totalorder %s3104_s14, %s3619_s1 }
 0x142   : > { %p2264_p2 = scmp.lt.u32.totalorder %s2262_s25, %s2257_s18  ;;  %p2266_p11 = scmp.lt.u32.totalorder %s2257_s18, %s3104_s14 }
 0x143   : > { %p2260_p12 = pnand %p2258_p1, %p3621_p9 }
 0x144   : > { %p2265_p10 = por %p2264_p2, %p2263_p3 }
 0x145   : > { %p2261_p4 = pneg %p2260_p12 }
 0x146   : > { %p2267_p5 = por %p2266_p11, %p2265_p10 }
 0x148   : > { %p2268_p7 = pnand %p2267_p5, %p2261_p4 }
 0x14a   : > { %2271 = shalt.err (!%p2268_p7)
}
 0x14b   : > { %s2272_s10 = scalar_lea.vmem %s493_s6, 128  ;;  %p3622_p13 = pmov %p3621_p9 }
 0x14c   : > { %p2273_p0 = scmp.ne.s32.totalorder %s493_s6, %s2272_s10  ;;  %s2599_s29 = smov [#allocation3]  }
 0x14d   : > { %s2277_s16 = sshll.u32 %s2599_s29, 4  ;;  %s2278_s16 = int_to_ptr.vmem [resolvable:$false] %s2277_s16 }
 0x14e   : > { %p2275_p8 = pnand %p2273_p0, %p3622_p13  ;;  %s2279_s12 = scalar_lea.vmem %s2278_s16, 256 }
 0x14f   : > { %p2280_p9 = scmp.lt.s32.totalorder %s493_s6, %s2278_s16  ;;  %p2281_p12 = scmp.lt.s32.totalorder %s2279_s12, %s2272_s10 }
 0x150   : > { %p2276_p1 = pneg %p2275_p8 }
 0x151   : > { %p2282_p2 = por %p2281_p12, %p2280_p9 }
 0x153   : > { %p2283_p3 = pnand %p2282_p2, %p2276_p1 }
 0x155   : > { %2286 = shalt.err (!%p2283_p3)
}
 0x156   : > { %1846 = dma.hbm_to_vmem [thread:$0]  (!%p3620_p6), %s3104_s14, 128, %s493_s6, %s482_s17  }
 0x157   : > { %s3623_s18 = sld [smem:[#allocation60_spill]]  ;;  %s521_s25 = scalar_lea.vmem [#allocation8], %s2995_s24 }
 0x158   : > { %s528_s21 = sshll.u32 %s521_s25, 4  ;;  %p3625_p10 = scmp.ne.s32.totalorder %s3607_s9, 0  ;;  %s3133_s21 = int_to_ptr.vmem [resolvable:$true] %s528_s21 }
 0x15d   : > { %s3624_s7 = smov %s3623_s18  ;;  %s3130_s26 = scalar_lea.hbm %s3623_s18, %s2998_s8 }
 0x15e   : > { %s2287_s2 = scalar_lea.hbm %s3130_s26, 256  ;;  %s2292_s6 = scalar_lea.hbm %s3624_s7, 1024 }
 0x15f   : > { %p2288_p4 = scmp.ne.s32.totalorder %s3130_s26, %s2287_s2  ;;  %p2293_p6 = scmp.lt.u32.totalorder %s3130_s26, %s3624_s7 }
 0x160   : > { %p2294_p7 = scmp.lt.u32.totalorder %s2292_s6, %s2287_s2  ;;  %p2296_p13 = scmp.lt.u32.totalorder %s2287_s2, %s3130_s26 }
 0x161   : > { %p2290_p11 = pnand %p2288_p4, %p3625_p10 }
 0x162   : > { %p2295_p0 = por %p2294_p7, %p2293_p6 }
 0x163   : > { %p2291_p5 = pneg %p2290_p11 }
 0x164   : > { %p2297_p8 = por %p2296_p13, %p2295_p0 }
 0x166   : > { %p2298_p1 = pnand %p2297_p8, %p2291_p5 }
 0x168   : > { %2301 = shalt.err (!%p2298_p1)
}
 0x169   : > { %s2302_s29 = scalar_lea.vmem %s3133_s21, 256  ;;  %s2600_s16 = smov [#allocation8]  }
 0x16a   : > { %p2303_p9 = scmp.ne.s32.totalorder %s3133_s21, %s2302_s29  ;;  %s2307_s12 = sshll.u32 %s2600_s16, 4  ;;  %s2308_s12 = int_to_ptr.vmem [resolvable:$false] %s2307_s12 }
 0x16b   : > { %s2309_s27 = scalar_lea.vmem %s2308_s12, 512  ;;  %p2310_p3 = scmp.lt.s32.totalorder %s3133_s21, %s2308_s12 }
 0x16c   : > { %p2305_p12 = pnand %p2303_p9, %p3625_p10  ;;  %p2311_p4 = scmp.lt.s32.totalorder %s2309_s27, %s2302_s29 }
 0x16e   : > { %p2306_p2 = pneg %p2305_p12  ;;  %p2312_p11 = por %p2311_p4, %p2310_p3 }
 0x170   : > { %p2313_p6 = pnand %p2312_p11, %p2306_p2 }
 0x172   : > { %2316 = shalt.err (!%p2313_p6)
}
 0x173   : > { %p3626_p5 = scmp.ne.s32.totalorder %s3605_s4, 0  ;;  %s3627_s5 = scalar_lea.sflag [#allocation7], %s2945_s3 }
 0x174   : > { %s3628_s2 = sld [smem:[#allocation62_spill]]  ;;  %s563_s14 = scalar_lea.vmem [#allocation11], %s2995_s24 }
 0x175   : > { %1852 = dma.hbm_to_vmem [thread:$0]  (!%p3626_p5), %s3130_s26, 256, %s3133_s21, %s3627_s5, %s3609_s11, %s3609_s11, %s3608_s0  }
 0x176   : > { %s570_s6 = sshll.u32 %s563_s14, 4  ;;  %s3629_s17 = sand.u32 1, %s2555_s30   ;;  %s3168_s6 = int_to_ptr.vmem [resolvable:$true] %s570_s6 }
 0x177   : > { %s3172_s10 = sshll.u32 %s3629_s17, 3 }
 0x17a   : > { %s3165_s28 = scalar_lea.hbm %s3628_s2, %s2998_s8  ;;  %s2322_s8 = scalar_lea.hbm %s3628_s2, 1024 }
 0x17b   : > { %s2317_s29 = scalar_lea.hbm %s3165_s28, 256  ;;  %p2323_p8 = scmp.lt.u32.totalorder %s3165_s28, %s3628_s2 }
 0x17c   : > { %p2318_p7 = scmp.ne.s32.totalorder %s3165_s28, %s2317_s29  ;;  %p2324_p1 = scmp.lt.u32.totalorder %s2322_s8, %s2317_s29 }
 0x17d   : > { %p2326_p12 = scmp.lt.u32.totalorder %s2317_s29, %s3165_s28 }
 0x17e   : > { %p2320_p0 = pnand %p2318_p7, %p3625_p10  ;;  %p2325_p9 = por %p2324_p1, %p2323_p8 }
 0x180   : > { %p2321_p13 = pneg %p2320_p0  ;;  %p2327_p2 = por %p2326_p12, %p2325_p9 }
 0x182   : > { %p2328_p3 = pnand %p2327_p2, %p2321_p13 }
 0x184   : > { %2331 = shalt.err (!%p2328_p3)
}
 0x185   : > { %s2332_s24 = scalar_lea.vmem %s3168_s6, 256  ;;  %s2601_s27 = smov [#allocation11]  }
 0x186   : > { %p2333_p4 = scmp.ne.s32.totalorder %s3168_s6, %s2332_s24  ;;  %s2337_s5 = sshll.u32 %s2601_s27, 4  ;;  %s2338_s5 = int_to_ptr.vmem [resolvable:$false] %s2337_s5 }
 0x187   : > { %s2339_s18 = scalar_lea.vmem %s2338_s5, 512  ;;  %p2340_p7 = scmp.lt.s32.totalorder %s3168_s6, %s2338_s5 }
 0x188   : > { %p2335_p11 = pnand %p2333_p4, %p3625_p10  ;;  %p2341_p0 = scmp.lt.s32.totalorder %s2339_s18, %s2332_s24 }
 0x18a   : > { %p2336_p6 = pneg %p2335_p11  ;;  %p2342_p8 = por %p2341_p0, %p2340_p7 }
 0x18c   : > { %p2343_p1 = pnand %p2342_p8, %p2336_p6 }
 0x18e   : > { %2346 = shalt.err (!%p2343_p1)
}
 0x18f   : > { %s3630_s25 = scalar_lea.sflag [#allocation10], %s2945_s3  ;;  %s1698_s14 = sshll.u32 %s2579_s19, 7 }
 0x190   : > { %1858 = dma.hbm_to_vmem [thread:$0]  (!%p3626_p5), %s3165_s28, 256, %s3168_s6, %s3630_s25, %s3609_s11, %s3609_s11, %s3608_s0  }
 0x191   : > { %s3631_s26 = sld [smem:[#allocation63_spill]]  ;;  %s584_s16 = scalar_lea.vmem [#allocation12], %s3172_s10 }
 0x192   : > { %s591_s12 = sshll.u32 %s584_s16, 4  ;;  %s581_s24 = scalar_lea.sflag [#allocation13], %s2945_s3  ;;  %s3207_s12 = int_to_ptr.vmem [resolvable:$true] %s591_s12 }
 0x197   : > { %s3632_s8 = smov %s3631_s26  ;;  %s3204_s21 = scalar_lea.hbm %s3631_s26, %s1698_s14 }
 0x198   : > { %s2347_s27 = scalar_lea.hbm %s3204_s21, 128  ;;  %s2352_s5 = scalar_lea.hbm %s3632_s8, 512 }
 0x199   : > { %p2348_p13 = scmp.ne.s32.totalorder %s3204_s21, %s2347_s27  ;;  %p2353_p2 = scmp.lt.u32.totalorder %s3204_s21, %s3632_s8 }
 0x19a   : > { %p2354_p3 = scmp.lt.u32.totalorder %s2352_s5, %s2347_s27  ;;  %p2356_p11 = scmp.lt.u32.totalorder %s2347_s27, %s3204_s21 }
 0x19b   : > { %p2350_p9 = pnand %p2348_p13, %p3625_p10 }
 0x19c   : > { %p2355_p4 = por %p2354_p3, %p2353_p2 }
 0x19d   : > { %p2351_p12 = pneg %p2350_p9 }
 0x19e   : > { %p2357_p6 = por %p2356_p11, %p2355_p4 }
 0x1a0   : > { %p2358_p7 = pnand %p2357_p6, %p2351_p12 }
 0x1a2   : > { %2361 = shalt.err (!%p2358_p7)
}
 0x1a3   : > { %s2362_s10 = scalar_lea.vmem %s3207_s12, 128  ;;  %s2602_s14 = smov [#allocation12]  }
 0x1a4   : > { %p2363_p0 = scmp.ne.s32.totalorder %s3207_s12, %s2362_s10  ;;  %s2367_s17 = sshll.u32 %s2602_s14, 4  ;;  %s2368_s17 = int_to_ptr.vmem [resolvable:$false] %s2367_s17 }
 0x1a5   : > { %s2369_s29 = scalar_lea.vmem %s2368_s17, 256  ;;  %p2370_p13 = scmp.lt.s32.totalorder %s3207_s12, %s2368_s17 }
 0x1a6   : > { %p2365_p8 = pnand %p2363_p0, %p3625_p10  ;;  %p2371_p9 = scmp.lt.s32.totalorder %s2369_s29, %s2362_s10 }
 0x1a8   : > { %p2366_p1 = pneg %p2365_p8  ;;  %p2372_p2 = por %p2371_p9, %p2370_p13 }
 0x1aa   : > { %p2373_p3 = pnand %p2372_p2, %p2366_p1 }
 0x1ac   : > { %2376 = shalt.err (!%p2373_p3)
}
 0x1ad   : > { %1861 = dma.hbm_to_vmem [thread:$0]  (!%p3626_p5), %s3204_s21, 128, %s3207_s12, %s581_s24, %s3609_s11, %s3609_s11, %s3608_s0  }
 0x1ae   : > { %s3633_s9 = sld [smem:[#allocation47_spill]] }
 0x1b4   : > { %p3634_p10 = scmp.ne.s32.totalorder %s3633_s9, 0 }
 0x1b5   : > { %s3239_s26 = sand.u32 (!%p3634_p10), 1, %s2563_s15   ;;  %p3635_p12 = scmp.ne.s32.totalorder (!%p3634_p10), %s3582_s13, 0 }
 0x1b6   : > { %603 = sbr.rel (%p3634_p10) target bundleno = 2802 (0xaf2), region = 68  ;;  %s1647_s16 = sshll.u32 (!%p3634_p10), %s3239_s26, 3 }
 0x1b7   : > { %s606_s4 = scalar_lea.sflag (!%p3634_p10), [#allocation4], %s3239_s26  ;;  %s3245_s27 = scalar_lea.vmem (!%p3634_p10), [#allocation3], %s1647_s16 }
 0x1bd   : > { %2490 = dma.done.wait (%p3635_p12), %s606_s4, 128  }
 0x1be   : > { %2492 = vsyncadd (%p3635_p12), %s606_s4, 4294967168  ;;  %s3636_s3 = sld [smem:[#allocation46_spill]]  ;;  %s1648_s11 = sshll.u32 %s3239_s26, 2 }
 0x1bf   : > { %s3253_s12 = scalar_lea.vmem [#allocation6], %s1648_s11 }
 0x1c4   : > { %s614_s0 = sand.u32 1, %s3636_s3  }
 0x1c5   : > { %s615_s21 = scalar_lea.sflag [#allocation7], %s614_s0 }
 0x1c6   : > { %2494 = dma.done.wait (%p3635_p12), %s615_s21, 64  }
 0x1c7   : > { %2496 = vsyncadd (%p3635_p12), %s615_s21, 4294967232  ;;  %s3637_s24 = sld [smem:[#allocation40_spill]]  ;;  %s3638_s28 = sld [smem:[#allocation52_spill]] }
 0x1cd   : > { %s625_s6 = sand.u32 1, %s3637_s24   ;;  %p3639_p5 = scmp.ne.s32.totalorder %s3638_s28, 0 }
 0x1ce   : > { %s3260_s5 = sshll.u32 %s625_s6, 4 }
 0x1cf   : > { %s627_s18 = scalar_lea.vmem [#allocation8], %s3260_s5 }
 0x1d0   : > { %2498 = dma.done.wait (%p3639_p5), %s615_s21, 256  }
 0x1d1   : > { %2500 = vsyncadd (%p3639_p5), %s615_s21, 4294967040  ;;  %s633_s25 = scalar_lea.sflag [#allocation10], %s614_s0  ;;  %s636_s10 = scalar_lea.vmem [#allocation9], %s3260_s5 }
 0x1d2   : > { %2502 = dma.done.wait (%p3639_p5), %s633_s25, 512  }
 0x1d3   : > { %2504 = vsyncadd (%p3639_p5), %s633_s25, 4294966784  ;;  %s3272_s13 = sshll.u32 %s625_s6, 3  ;;  %s645_s14 = scalar_lea.vmem [#allocation11], %s3260_s5 }
 0x1d4   : > { %s651_s17 = scalar_lea.sflag [#allocation13], %s614_s0  ;;  %s654_s29 = scalar_lea.vmem [#allocation12], %s3272_s13 }
 0x1d5   : > { %2506 = dma.done.wait (%p3639_p5), %s651_s17, 128  }
 0x1d6   : > { %2508 = vsyncadd (%p3639_p5), %s651_s17, 4294967168  ;;  %p3640_p4 = scmp.eq.s32.totalorder %s3636_s3, 0 }
 0x1d8   : > { %2510 = dma.done.wait (%p3640_p4), [#allocation13], 16   ;;  %p3641_p11 = pmov %p3640_p4 }
 0x1d9   : > { %p3642_p6 = pmov %p3640_p4 }
 0x1da   : > { %2512 = vsyncadd (%p3641_p11), [#allocation13], 4294967280 }
 0x1db   : > { %2514 = dma.done.wait (%p3642_p6), [#allocation16], 272   ;;  %p3643_p7 = pmov %p3640_p4 }
 0x1dc   : > { %p3644_p0 = pmov %p3640_p4 }
 0x1dd   : > { %2516 = vsyncadd (%p3643_p7), [#allocation16], 4294967024 }
 0x1de   : > { %2518 = dma.done.wait (%p3644_p0), [#allocation19], 528   ;;  %p3645_p8 = pmov %p3644_p0 }
 0x1df   : > { %p3646_p1 = pmov %p3644_p0 }
 0x1e0   : > { %2520 = vsyncadd (%p3645_p8), [#allocation19], 4294966768 }
 0x1e1   : > { %2522 = dma.done.wait (%p3646_p1), [#allocation22], 16   ;;  %p3647_p13 = pmov %p3644_p0 }
 0x1e2   : > { %v2603_v0 = vmov 0.0   ;;  %vm2604_vm0 = vmmov 0   ;;  %v2008_v1 = vld [vmem:[%s636_s10] sm:$0xff]   ;;  %v2009_v2 = vld [vmem:[%s636_s10 + $0x8] sm:$0xff]   ;;  %vm770_vm1 = vcmask 261120   ;;  %vm928_vm2 = vcmask 130048  }
 0x1e3   : > { %2524 = vsyncadd (%p3647_p13), [#allocation22], 4294967280  ;;  %1730 = vmatprep.subr.bf16.mxu1 %v2603_v0  ;;  %1722 = vmatprep.subr.bf16.mxu0 %v2603_v0  ;;  %v2010_v3 = vld [vmem:[%s627_s18] sm:$0xff]   ;;  %v2011_v5 = vld [vmem:[%s627_s18 + $0x8] sm:$0xff]   ;;  %vm979_vm3 = vcmask 64512   ;;  %s3648_s9 = sld [smem:[#allocation38_spill]] }
 0x1e4   : > { %1734 = vmatprep.mubr.msk.bf16.mxu1 %vm2604_vm0, %v2603_v0  ;;  %1726 = vmatprep.mubr.msk.bf16.mxu0 %vm2604_vm0, %v2603_v0  ;;  %v3306_v4 = vld [vmem:[%s3245_s27] sm:$0xff]  ;;  %v976_v20 = vld [vmem:[%s3253_s12] sm:$0xf]  ;;  %vm997_vm4 = vcmask 1043456   ;;  %s3347_s0 = scalar_lea.vmem [#allocation23], %s1647_s16  ;;  %s3649_s11 = sld [smem:[#allocation43_spill]] }
 0x1e5   : > { %1731 = vmatpush3.bf16.msra.mxu1 %v2008_v1  ;;  %1723 = vmatpush3.bf16.msra.mxu0 %v2010_v3  ;;  %v753_v6 = vpack.c.bf16 %v3306_v4, %v3306_v4  ;;  %v2012_v18 = vld [vmem:[%s645_s14] sm:$0xff]   ;;  %v2013_v19 = vld [vmem:[%s645_s14 + $0x8] sm:$0xff]   ;;  %v977_v21 = vunpack.c.l.bf16 %v976_v20 }
 0x1e6   : > { %1732 = vmatprep.subr.bf16.mxu1 %v2603_v0  ;;  %1724 = vmatprep.subr.bf16.mxu0 %v2603_v0 }
 0x1e9   : > { %1733 = vmatpush3.bf16.msra.mxu1 %v2009_v2  ;;  %1725 = vmatpush3.bf16.msra.mxu0 %v2011_v5  ;;  %s748_s4 = sand.u32 1, %s3648_s9  }
 0x1ea   : > { %1746 = vmatprep.subr.bf16.mxu1 %v2603_v0  ;;  %1738 = vmatprep.subr.bf16.mxu0 %v2603_v0  ;;  %s3338_s27 = sshll.u32 %s748_s4, 3  ;;  %p1672_p9 = scmp.ne.s32.totalorder %s3649_s11, 0 }
 0x1eb   : > { %s750_s3 = scalar_lea.vmem [#allocation24], %s3338_s27  ;;  %v2605_v48 = vmov (!%p1672_p9), 0.0  }
 0x1ec   : > { %1735 = vmatmul.mubr.msk.bf16.vlgmr.msra.gmra.mrb[0].mxu1 %vm770_vm1, %v753_v6  ;;  %1727 = vmatmul.mubr.msk.bf16.vlgmr.msra.gmra.mrb[0].mxu0 %vm770_vm1, %v753_v6  ;;  %1045 = vst.msk [vmem:[#allocation2] sm:$0xff] (!%p1672_p9), %vm770_vm1, %v2605_v48 }
 0x1ed   : > { %1748 = vmatprep.mubr.msk.bf16.mxu1 %vm2604_vm0, %v2603_v0  ;;  %1742 = vmatprep.mubr.msk.bf16.mxu0 %vm2604_vm0, %v2603_v0 }
 0x1ee   : > { %1739 = vmatpush3.bf16.msra.mxu0 %v2012_v18 }
 0x1ef   : > { %1740 = vmatprep.subr.bf16.mxu0 %v2603_v0 }
 0x1f2   : > { %1741 = vmatpush3.bf16.msra.mxu0 %v2013_v19 }
 0x1f3   : > { %1752 = vmatprep.subr.bf16.mxu0 %v2603_v0 }
 0x1f5   : > { %1743 = vmatmul.mubr.msk.bf16.vlgmr.msra.gmra.mrb[4].mxu0 %vm770_vm1, %v753_v6 }
 0x1f6   : > { %1754 = vmatprep.mubr.msk.bf16.mxu0 %vm2604_vm0, %v2603_v0 }
 0x2bf   : > { %v864_v7 = vpop.f32.mrb[0].mxu1  ;;  %v808_v11 = vpop.f32.mrb[0].mxu0 }
 0x2c0   : > { %v927_v8 = vpack.c.bf16 %v864_v7, %v864_v7  ;;  %v1736_v9 = vpop.f32.mrb[1].mxu1  ;;  %v1728_v14 = vpop.f32.mrb[1].mxu0  ;;  %v926_v17 = vpack.c.bf16 %v808_v11, %v808_v11 }
 0x2c1   : > { %v867_v10 = vpop.f32.mrb[2].mxu1  ;;  %v811_v15 = vpop.f32.mrb[2].mxu0 }
 0x2c2   : > { %v933_v12 = vsel %vm928_vm2, %v927_v8, 0  ;;  %v1737_v13 = vpop.f32.mrb[3].mxu1  ;;  %v1729_v16 = vpop.f32.mrb[3].mxu0 }
 0x2c3   : > { %1747 = vmatpush3.bf16.xpose.msra.mxu1 %v933_v12 }
 0x2c8   : > { %v920_v34 = vpop.f32.mrb[4].mxu0 }
 0x2c9   : > { %v1744_v35 = vpop.f32.mrb[5].mxu0  ;;  %v993_v38 = vpack.c.bf16 %v920_v34, %v920_v34 }
 0x2ca   : > { %1749 = vmatmul.mubr.msk.bf16.vlgmr.msra.gmra.mrb[4].mxu1 %vm928_vm2, %v926_v17  ;;  %v923_v36 = vpop.f32.mrb[6].mxu0 }
 0x2cb   : > { %v1745_v37 = vpop.f32.mrb[7].mxu0  ;;  %v999_v39 = vsel %vm997_vm4, %v993_v38, 0 }
 0x2cc   : > { %1753 = vmatpush3.bf16.msra.mxu0 %v999_v39 }
 0x39d   : > { %v969_v22 = vpop.f32.mrb[4].mxu1 }
 0x39e   : > { %v975_v23 = vmul.f32 0.25, %v969_v22  ;;  %v1750_v24 = vpop.f32.mrb[5].mxu1 }
 0x39f   : > { %v972_v25 = vpop.f32.mrb[6].mxu1 }
 0x3a0   : > { %v1751_v26 = vpop.f32.mrb[7].mxu1  ;;  %v978_v27 = vadd.f32 %v977_v21, %v975_v23 }
 0x3a2   : > { %v980_v28 = vsel %vm979_vm3, %v978_v27, -inf }
 0x3a3   : > { %981 = vmax.xlane.f32.xlu0 %v980_v28 }
 0x430   : > { %v982_v29 = vpop.xlane.xlu0 %981 }
 0x431   : > { %v983_v30 = vsub.f32 %v978_v27, %v982_v29 }
 0x433   : > { %v984_v31 = vmul.f32 1.442695, %v983_v30 }
 0x435   : > { %2014 = vpow2.f32 %v984_v31 }
 0x43f   : > { %v2015_v32 = vpop.eup %2014 }
 0x440   : > { %v986_v33 = vsel %vm979_vm3, %v2015_v32, 0.0 }
 0x441   : > { %987 = vadd.xlane.f32.xlu0 %v986_v33 }
 0x4ce   : > { %v988_v40 = vpop.xlane.xlu0 %987 }
 0x4cf   : > { %2016 = vrcp.f32 %v988_v40 }
 0x4d9   : > { %v2017_v41 = vpop.eup %2016 }
 0x4da   : > { %v990_v42 = vmul.f32 %v2017_v41, %v2015_v32 }
 0x4dc   : > { %991 = vst.msk [vmem:[%s750_s3] sm:$0xff] %vm979_vm3, %v990_v42  ;;  %v992_v43 = vpack.c.bf16 %v990_v42, %v990_v42 }
 0x4de   : > { %1755 = vmatmul.mubr.msk.bf16.vlgmr.msra.gmra.mrb[8].mxu0 %vm979_vm3, %v992_v43 }
 0x5ae   : > { %1044 = sbr.rel (%p1672_p9) target bundleno = 1461 (0x5b5), region = 120 }
 0x5b1   : > { %v1035_v44 = vpop.f32.mrb[8].mxu0 }
 0x5b2   : > { %v1756_v45 = vpop.f32.mrb[9].mxu0 }
 0x5b3   : > { %v1038_v46 = vpop.f32.mrb[10].mxu0 }
 0x5b4   : > { %v1757_v47 = vpop.f32.mrb[11].mxu0 }
 0x5b5 PF: > { %1758 = vmatprep.subr.bf16.mxu1 %v2603_v0  ;;  %v2018_v49 = vld [vmem:[%s654_s29] sm:$0xff]   ;;  %1760 = vmatprep.mubr.msk.bf16.mxu1 %vm2604_vm0, %v2603_v0  ;;  %v1047_v50 = vpack.c.bf16 %v1035_v44, %v1035_v44  ;;  %s3650_s16 = sld [smem:[#allocation43_spill]] }
 0x5b6   : > { %1759 = vmatpush3.bf16.msra.mxu1 %v2018_v49  ;;  %v1046_v51 = vld [vmem:[#allocation2] sm:$0xff] }
 0x5b9   : > { %1761 = vmatmul.mubr.msk.bf16.vlgmr.msra.gmra.mrb[8].mxu1 %vm928_vm2, %v1047_v50 }
 0x5bb   : > { %p1675_p2 = scmp.ne.s32.totalorder %s3650_s16, 3 }
 0x5bc   : > { %v2019_v1 = vld [vmem:[#allocation17] sm:$0xff] (!%p1675_p2)   ;;  %v2606_v2 = vmov (!%p1675_p2), 0.0   ;;  %vm2607_vm5 = vmmov (!%p1675_p2), 0   ;;  %v2020_v3 = vld [vmem:[#allocation17 + $0x8] sm:$0xff] (!%p1675_p2)   ;;  %v2022_v5 = vld [vmem:[#allocation18 + $0x8] sm:$0xff] (!%p1675_p2)   ;;  %vm1231_vm6 = vcmask (!%p1675_p2), 523264  }
 0x5bd   : > { %1764 = vmatprep.subr.bf16.mxu0 (!%p1675_p2), %v2606_v2  ;;  %1768 = vmatprep.mubr.msk.bf16.mxu0 (!%p1675_p2), %vm2607_vm5, %v2606_v2  ;;  %v2023_v6 = vld [vmem:[#allocation18 + $0x10] sm:$0xff] (!%p1675_p2)   ;;  %v1676_v11 = vld [vmem:[#allocation14] ss:$0 sm:$0xff] (!%p1675_p2)  ;;  %v1677_v13 = vld [vmem:[#allocation15] ss:$0 sm:$0xff] (!%p1675_p2) }
 0x5be   : > { %1765 = vmatpush3.bf16.msra.mxu0 (!%p1675_p2), %v2019_v1  ;;  %1772 = vmatprep.subr.bf16.mxu1 (!%p1675_p2), %v2606_v2  ;;  %v2024_v17 = vld [vmem:[#allocation18 + $0x18] sm:$0xff] (!%p1675_p2)   ;;  %v1686_v39 = vld [vmem:[#allocation20] ss:$0 sm:$0xff] (!%p1675_p2)  ;;  %v1687_v41 = vld [vmem:[#allocation21] ss:$0 sm:$0xff] (!%p1675_p2) }
 0x5bf   : > { %1766 = vmatprep.subr.bf16.mxu0 (!%p1675_p2), %v2606_v2  ;;  %1780 = vmatprep.mubr.msk.bf16.mxu1 (!%p1675_p2), %vm2607_vm5, %v2606_v2 }
 0x5c2   : > { %1767 = vmatpush3.bf16.msra.mxu0 (!%p1675_p2), %v2020_v3 }
 0x689   : > { %1104 = sbr.rel (%p1675_p2) target bundleno = 2748 (0xabc), region = 124 }
 0x68c   : > { %v1093_v52 = vpop.f32.mrb[8].mxu1 }
 0x68d   : > { %v1099_v53 = vadd.f32 %v1093_v52, %v1046_v51  ;;  %v1762_v54 = vpop.f32.mrb[9].mxu1 }
 0x68e   : > { %v1096_v55 = vpop.f32.mrb[10].mxu1 }
 0x68f   : > { %1100 = vst.msk [vmem:[#allocation2] sm:$0xff] %vm770_vm1, %v1099_v53  ;;  %v1763_v56 = vpop.f32.mrb[11].mxu1 }
 0x696   : > { %v1105_v57 = vld [vmem:[#allocation2] sm:$0xff] }
 0x697   : > { %v1106_v58 = vadd.f32 %v1105_v57, %v3306_v4  ;;  %v2021_v4 = vld [vmem:[#allocation18] sm:$0xff]  }
 0x698   : > { %1773 = vmatpush3.bf16.msra.mxu1 %v2021_v4 }
 0x699   : > { %v1109_v59 = vsel %vm770_vm1, %v1106_v58, 0.0  ;;  %1774 = vmatprep.subr.bf16.mxu1 %v2606_v2 }
 0x69a   : > { %1110 = vadd.xlane.f32.xlu0 %v1109_v59 }
 0x69c   : > { %1775 = vmatpush3.bf16.msra.mxu1 %v2022_v5 }
 0x69d   : > { %1776 = vmatprep.subr.bf16.mxu1 %v2606_v2 }
 0x6a0   : > { %1777 = vmatpush3.bf16.msra.mxu1 %v2023_v6 }
 0x6a1   : > { %1778 = vmatprep.subr.bf16.mxu1 %v2606_v2 }
 0x6a4   : > { %1779 = vmatpush3.bf16.msra.mxu1 %v2024_v17 }
 0x727   : > { %v1111_v60 = vpop.xlane.xlu0 %1110 }
 0x728   : > { %v1113_v61 = vmul.f32 0.03125, %v1111_v60 }
 0x72a   : > { %v1114_v62 = vsub.f32 %v1106_v58, %v1113_v61 }
 0x72c   : > { %v1115_v63 = vmul.f32 %v1114_v62, %v1114_v62 }
 0x72e   : > { %v1116_v0 = vsel %vm770_vm1, %v1115_v63, 0.0 }
 0x72f   : > { %1117 = vadd.xlane.f32.xlu0 %v1116_v0 }
 0x7bc   : > { %v1118_v7 = vpop.xlane.xlu0 %1117 }
 0x7bd   : > { %v1119_v8 = vmul.f32 0.03125, %v1118_v7 }
 0x7bf   : > { %v1120_v9 = vadd.f32 1e-05, %v1119_v8 }
 0x7c1   : > { %2025 = vrsqrt.f32 %v1120_v9 }
 0x7cb   : > { %v2026_v10 = vpop.eup %2025 }
 0x7cc   : > { %v1122_v12 = vmul.f32 %v2026_v10, %v1114_v62 }
 0x7ce   : > { %v1129_v14 = vmul.f32 %v1676_v11, %v1122_v12 }
 0x7d0   : > { %v1136_v15 = vadd.f32 %v1677_v13, %v1129_v14 }
 0x7d2   : > { %v1137_v16 = vpack.c.bf16 %v1136_v15, %v1136_v15 }
 0x7d4   : > { %1769 = vmatmul.mubr.msk.bf16.vlgmr.msra.gmra.mrb[0].mxu0 %vm770_vm1, %v1137_v16 }
 0x8a7   : > { %v1191_v18 = vpop.f32.mrb[0].mxu0 }
 0x8a8   : > { %v1197_v19 = vmax.f32 %v1191_v18, 0.0  ;;  %v1770_v20 = vpop.f32.mrb[1].mxu0 }
 0x8a9   : > { %v1194_v21 = vpop.f32.mrb[2].mxu0 }
 0x8aa   : > { %v1198_v22 = vpack.c.bf16 %v1197_v19, %v1197_v19  ;;  %v1771_v23 = vpop.f32.mrb[3].mxu0 }
 0x8ac   : > { %1781 = vmatmul.mubr.msk.bf16.vlgmr.msra.gmra.mrb[0].mxu1 %vm1231_vm6, %v1198_v22 }
 0x97f   : > { %v1269_v24 = vpop.f32.mrb[0].mxu1 }
 0x980   : > { %v1270_v25 = vadd.f32 %v1269_v24, %v1136_v15  ;;  %v1782_v26 = vpop.f32.mrb[1].mxu1 }
 0x981   : > { %v1272_v27 = vpop.f32.mrb[2].mxu1 }
 0x982   : > { %v1783_v28 = vpop.f32.mrb[3].mxu1  ;;  %v1277_v29 = vsel %vm770_vm1, %v1270_v25, 0.0 }
 0x983   : > { %1278 = vadd.xlane.f32.xlu1 %v1277_v29 }
 0xa10   : > { %v1279_v30 = vpop.xlane.xlu1 %1278 }
 0xa11   : > { %v1280_v31 = vmul.f32 0.03125, %v1279_v30 }
 0xa13   : > { %v1281_v32 = vsub.f32 %v1270_v25, %v1280_v31 }
 0xa15   : > { %v1282_v33 = vmul.f32 %v1281_v32, %v1281_v32 }
 0xa17   : > { %v1283_v34 = vsel %vm770_vm1, %v1282_v33, 0.0 }
 0xa18   : > { %1284 = vadd.xlane.f32.xlu1 %v1283_v34 }
 0xaa5   : > { %v1285_v35 = vpop.xlane.xlu1 %1284 }
 0xaa6   : > { %v1286_v36 = vmul.f32 0.03125, %v1285_v35 }
 0xaa8   : > { %v1287_v37 = vadd.f32 1e-05, %v1286_v36 }
 0xaaa   : > { %2027 = vrsqrt.f32 %v1287_v37 }
 0xab4   : > { %v2028_v38 = vpop.eup %2027 }
 0xab5   : > { %v1289_v40 = vmul.f32 %v2028_v38, %v1281_v32 }
 0xab7   : > { %v1296_v42 = vmul.f32 %v1686_v39, %v1289_v40 }
 0xab9   : > { %v1303_v43 = vadd.f32 %v1687_v41, %v1296_v42 }
 0xabb   : > { %1304 = vst.msk [vmem:[%s3347_s0] sm:$0xff] %vm770_vm1, %v1303_v43 }
 0xabc PF: > { %s3651_s21 = sld [smem:[#allocation44_spill]]  ;;  %s3652_s12 = sld [smem:[#allocation53_spill]] }
 0xabd   : > { %s3653_s5 = sld [smem:[#allocation70_spill]]  ;;  %s1324_s25 = sshll.u32 %s3347_s0, 4  ;;  %s1325_s25 = int_to_ptr.vmem [resolvable:$true] %s1324_s25 }
 0xabe   : > { %s1306_s10 = scalar_lea.sflag [#allocation5], %s3239_s26  ;;  %s2377_s13 = scalar_lea.vmem %s1325_s25, 128 }
 0xabf   : > { %p2378_p3 = scmp.ne.s32.totalorder %s1325_s25, %s2377_s13  ;;  %s2608_s14 = smov [#allocation23]  }
 0xac0   : > { %s2381_s17 = sshll.u32 %s2608_s14, 4  ;;  %s2382_s17 = int_to_ptr.vmem [resolvable:$false] %s2381_s17 }
 0xac1   : > { %s2383_s29 = scalar_lea.vmem %s2382_s17, 256  ;;  %p2384_p4 = scmp.lt.s32.totalorder %s1325_s25, %s2382_s17 }
 0xac2   : > { %s1690_s24 = sshll.u32 %s3651_s21, 7  ;;  %p3654_p10 = scmp.ne.s32.totalorder %s3652_s12, 0 }
 0xac3   : > { %s3371_s18 = scalar_lea.hbm %s3653_s5, %s1690_s24  ;;  %p2385_p11 = scmp.lt.s32.totalorder %s2383_s29, %s2377_s13 }
 0xac4   : > { %p2379_p12 = pnand %p2378_p3, %p3654_p10 }
 0xac5   : > { %p2386_p6 = por %p2385_p11, %p2384_p4 }
 0xac6   : > { %p2380_p5 = pneg %p2379_p12 }
 0xac8   : > { %p2387_p7 = pnand %p2386_p6, %p2380_p5 }
 0xaca   : > { %2390 = shalt.err (!%p2387_p7)
}
 0xacb   : > { %s2391_s26 = scalar_lea.hbm %s3371_s18, 128  ;;  %s2395_s11 = scalar_lea.hbm %s3653_s5, 256 }
 0xacc   : > { %p2392_p0 = scmp.ne.s32.totalorder %s3371_s18, %s2391_s26  ;;  %p2396_p13 = scmp.lt.u32.totalorder %s3371_s18, %s3653_s5 }
 0xacd   : > { %p2397_p9 = scmp.lt.u32.totalorder %s2395_s11, %s2391_s26  ;;  %p2399_p3 = scmp.lt.u32.totalorder %s2391_s26, %s3371_s18 }
 0xace   : > { %p2393_p8 = pnand %p2392_p0, %p3654_p10 }
 0xacf   : > { %p2398_p2 = por %p2397_p9, %p2396_p13 }
 0xad0   : > { %p2394_p1 = pneg %p2393_p8 }
 0xad1   : > { %p2400_p12 = por %p2399_p3, %p2398_p2 }
 0xad3   : > { %p2401_p5 = pnand %p2400_p12, %p2394_p1 }
 0xad5   : > { %2404 = shalt.err (!%p2401_p5)
}
 0xad6   : > { %s3655_s28 = sld [smem:[#allocation43_spill]]  ;;  %s1691_s14 = sshll.u32 %s3651_s21, 2 }
 0xad7   : > { %s3657_s13 = sld [smem:[#allocation56_spill]]  ;;  %s1339_s17 = sshll.u32 %s750_s3, 4  ;;  %s3396_s17 = int_to_ptr.vmem [resolvable:$true] %s1339_s17 }
 0xad8   : > { %1820 = dma.vmem_to_hbm [thread:$0]  (%p3654_p10), %s1325_s25, 128, %s3371_s18, %s1306_s10  }
 0xad9   : > { %s3658_s12 = sld [smem:[#allocation71_spill]]  ;;  %s1311_s16 = scalar_lea.sflag [#allocation25], %s748_s4 }
 0xada   : > { %s2405_s24 = scalar_lea.vmem %s3396_s17, 128  ;;  %s2609_s27 = smov [#allocation24]  }
 0xadb   : > { %p2406_p4 = scmp.ne.s32.totalorder %s3396_s17, %s2405_s24  ;;  %s2409_s3 = sshll.u32 %s2609_s27, 4  ;;  %s2410_s3 = int_to_ptr.vmem [resolvable:$false] %s2409_s3 }
 0xadc   : > { %s1335_s29 = sadd.s32 %s3655_s28, %s1691_s14  ;;  %s2411_s21 = scalar_lea.vmem %s2410_s3, 256 }
 0xadd   : > { %s1692_s26 = sshll.u32 %s1335_s29, 7  ;;  %p3659_p11 = scmp.ne.s32.totalorder %s3657_s13, 0 }
 0xade   : > { %p2412_p7 = scmp.lt.s32.totalorder %s3396_s17, %s2410_s3  ;;  %p2413_p0 = scmp.lt.s32.totalorder %s2411_s21, %s2405_s24 }
 0xadf   : > { %s1337_s11 = scalar_lea.hbm %s3658_s12, %s1692_s26  ;;  %p2407_p10 = pnand %p2406_p4, %p3659_p11 }
 0xae0   : > { %p2414_p8 = por %p2413_p0, %p2412_p7 }
 0xae1   : > { %p2408_p6 = pneg %p2407_p10 }
 0xae3   : > { %p2415_p1 = pnand %p2414_p8, %p2408_p6 }
 0xae5   : > { %2418 = shalt.err (!%p2415_p1)
}
 0xae6   : > { %s2419_s18 = scalar_lea.hbm %s1337_s11, 128  ;;  %s2423_s10 = scalar_lea.hbm %s3658_s12, 1024 }
 0xae7   : > { %p2420_p13 = scmp.ne.s32.totalorder %s1337_s11, %s2419_s18  ;;  %p2424_p3 = scmp.lt.u32.totalorder %s1337_s11, %s3658_s12 }
 0xae8   : > { %p2425_p12 = scmp.lt.u32.totalorder %s2423_s10, %s2419_s18  ;;  %p2427_p4 = scmp.lt.u32.totalorder %s2419_s18, %s1337_s11 }
 0xae9   : > { %p2421_p9 = pnand %p2420_p13, %p3659_p11 }
 0xaea   : > { %p2426_p5 = por %p2425_p12, %p2424_p3 }
 0xaeb   : > { %p2422_p2 = pneg %p2421_p9 }
 0xaec   : > { %p2428_p10 = por %p2427_p4, %p2426_p5 }
 0xaee   : > { %p2429_p6 = pnand %p2428_p10, %p2422_p2 }
 0xaf0   : > { %2432 = shalt.err (!%p2429_p6)
}
 0xaf1   : > { %1821 = dma.vmem_to_hbm [thread:$0]  (%p3659_p11), %s3396_s17, 128, %s1337_s11, %s1311_s16  }
 0xaf2 PF: > { %s3660_s14 = sld [smem:[#allocation45_spill]]  ;;  %s3661_s29 = sld [smem:[#allocation41_spill]] }
 0xaf3   : > { %s3662_s26 = sld [smem:[#allocation54_spill]] }
 0xaf8   : > { %p1882_p7 = scmp.ge.s32.totalorder %s3660_s14, 2  ;;  %s1351_s9 = sand.u32 1, %s3661_s29  }
 0xaf9   : > { %p3663_p0 = scmp.ne.s32.totalorder %s3662_s26, 0  ;;  %s1352_s0 = scalar_lea.sflag [#allocation5], %s1351_s9 }
 0xafb   : > { %p1863_p8 = pnand %p1882_p7, %p3663_p0 }
 0xafd   : > { %2526 = dma.done.wait (!%p1863_p8), %s1352_s0, 128  }
 0xafe   : > { %2528 = vsyncadd (!%p1863_p8), %s1352_s0, 4294967168  ;;  %s3664_s24 = sld [smem:[#allocation37_spill]]  ;;  %s3665_s27 = sld [smem:[#allocation57_spill]] }
 0xb04   : > { %s1360_s3 = sand.u32 1, %s3664_s24   ;;  %p3666_p1 = scmp.ne.s32.totalorder %s3665_s27, 0 }
 0xb05   : > { %s1361_s21 = scalar_lea.sflag [#allocation25], %s1360_s3 }
 0xb06   : > { %p1866_p13 = pnand %p1882_p7, %p3666_p1 }
 0xb08   : > { %2530 = dma.done.wait (!%p1866_p13), %s1361_s21, 128  }
 0xb09   : > { %2532 = vsyncadd (!%p1866_p13), %s1361_s21, 4294967168  ;;  %s45_s21 = sadd.s32 1, %s3660_s14   ;;  %s3668_s25 = sld [smem:[#allocation38_spill]] }
 0xb0a   : > { %p3427_p11 = scmp.ge.s32.totalorder %s45_s21, 10   ;;  %s3669_s26 = sld [smem:[#allocation39_spill]] }
 0xb0b   : > { %s3670_s27 = sld [smem:[#allocation55_spill]]  ;;  %s3671_s28 = sld [smem:[#allocation40_spill]] }
 0xb0c   : > { %s3672_s17 = sld [smem:[#allocation50_spill]]  ;;  %s3673_s11 = sld [smem:[#allocation42_spill]] }
 0xb0d   : > { %s3674_s16 = sld [smem:[#allocation51_spill]]  ;;  %s3675_s4 = sld [smem:[#allocation48_spill]] }
 0xb0e   : > { %s3676_s10 = sld [smem:[#allocation49_spill]]  ;;  %s3677_s29 = smov %s2555_s30 }
 0xb0f   : > { %s3679_s14 = smov %s2563_s15  ;;  %s3682_s18 = smov %s2583_s20 }
 0xb10   :  { %44 = sbr.rel (!%p3427_p11) target bundleno = 36 (0x24), region = 223 }
 0xb12   : > { %s3678_s30 = smov %s3672_s17  ;;  %s3680_s15 = smov %s3673_s11 }
 0xb13   : > { %s3681_s17 = smov %s2579_s19  ;;  %s3683_s19 = smov %s3675_s4 }
 0xb14   : > { %s3684_s20 = smov %s3676_s10 }
 0xb17   :  { %1366 = vsyncpa [#allocation4], 1 }
 0xb18   :  { %1368 = vsyncpa [#allocation4 + $0x1], 1 }
 0xb19   :  { %1369 = vsyncpa [#allocation7], 1 }
 0xb1a   :  { %1371 = vsyncpa [#allocation7 + $0x1], 1 }
 0xb1b   :  { %1372 = vsyncpa [#allocation10], 1 }
 0xb1c   :  { %1374 = vsyncpa [#allocation10 + $0x1], 1 }
 0xb1d   :  { %1375 = vsyncpa [#allocation13], 1 }
 0xb1e   :  { %1377 = vsyncpa [#allocation13 + $0x1], 1 }
 0xb1f   :  { %1378 = vsyncpa [#allocation16], 1 }
 0xb20   :  { %1379 = vsyncpa [#allocation19], 1 }
 0xb21   :  { %1380 = vsyncpa [#allocation22], 1 }
 0xb22   :  { %1381 = vsyncpa [#allocation5], 1 }
 0xb23   :  { %1383 = vsyncpa [#allocation5 + $0x1], 1 }
 0xb24   :  { %1384 = vsyncpa [#allocation25], 1 }
 0xb25   :  { %1386 = vsyncpa [#allocation25 + $0x1], 1 }

</bundles_post_ra>
